<compile_context>
chip_gen: v7x
topology: tpu7x:2x2x1
jax: 0.10.0
libtpu: 0.0.40
codegen_flags: <defaults>
</compile_context>

<pallas_src>
import math
import numpy as np
import jax
import jax.numpy as jnp
from jax.experimental import pallas as pl
from jax.experimental.pallas import tpu as pltpu

L_3D = 4
L_VIEW = 2
D_IN3 = 3 + 6 * L_3D      # 27
D_INV = 3 + 6 * L_VIEW    # 15
FEAT = 32
RGB_HID = 16

# ---------------------------------------------------------------------------
# Parameter slab layout (single f32 slab, 128 lanes wide, static row offsets).
# Weights are stored transposed: (out_features, in_features); the bias is an
# extra trailing column where present.
# ---------------------------------------------------------------------------
SLAB_W = 128
_BLOCK_SHAPES = [
    ("pe3",  (D_IN3, 5)),            # cols 0:3 = P^T, col 3 = phase, col 4 = id-mask
    ("pev",  (D_INV, 5)),
    ("l0",   (FEAT, D_IN3 + 1)),     # (32, 28)  W0^T | b0
    ("l1",   (FEAT, FEAT + 1)),      # (32, 33)  W1^T | b1
    ("l2f",  (FEAT + 1, FEAT)),      # (33, 32)  skip layer, feat-input part
    ("l2p",  (FEAT + 1, D_IN3 + 1)), # (33, 28)  skip layer, posenc-input part | b2
    ("lr0f", (RGB_HID, FEAT)),       # (16, 32)
    ("lr0r", (RGB_HID, D_INV + 1)),  # (16, 16)  Wr0(ray)^T | br0
    ("lr1",  (3, RGB_HID + 1)),      # (3, 17)   Wr1^T | br1
]


def _round8(n):
    return ((n + 7) // 8) * 8


def _slab_layout():
    offs, r = {}, 0
    for name, (nr, nc) in _BLOCK_SHAPES:
        offs[name] = (r, nr, nc)
        r += _round8(nr)
    return offs, _round8(r)


SLAB_OFFS, SLAB_ROWS = _slab_layout()   # 232 rows


# ---------------------------------------------------------------------------
# Positional encoding as a (D,3) projection + phase + identity mask, in the
# transposed (features-on-sublanes) layout.  Row order matches
#   torch.cat([x, stack([sin, cos], dim=-2).view(..., -1)], dim=-1):
#   [x0, x1, x2, sin(f*x0)... , cos(f*x0)..., sin(f*x1)..., ...]
# ---------------------------------------------------------------------------
def make_posenc_block(L):
    D = 3 + 6 * L
    Pt = np.zeros((D, 3), np.float32)
    phase = np.zeros((D, 1), np.float32)
    idm = np.zeros((D, 1), np.float32)
    freqs = (2.0 ** np.arange(L)).astype(np.float32) * np.pi
    for d in range(3):
        Pt[d, d] = 1.0
        idm[d, 0] = 1.0
        base = 3 + d * 2 * L
        Pt[base:base + L, d] = freqs                  # sin rows
        Pt[base + L:base + 2 * L, d] = freqs          # cos rows
        phase[base + L:base + 2 * L, 0] = np.pi / 2   # cos(z) = sin(z + pi/2)
    return np.concatenate([Pt, phase, idm], axis=1)   # (D, 5)


def xavier(key, k_in, k_out, gain=1.0):
    bound = gain * math.sqrt(6.0 / (k_in + k_out))
    return jax.random.uniform(key, (k_in, k_out), jnp.float32, -bound, bound)


def init_params(key):
    """Logical params, stored as (k_in, k_out) like the PyTorch reference."""
    relu_gain = math.sqrt(2.0)  # torch.nn.init.calculate_gain('relu')
    ks = jax.random.split(key, 6)
    p = {}
    p["w0"] = xavier(ks[0], D_IN3, FEAT, relu_gain)
    p["b0"] = jnp.zeros((FEAT,), jnp.float32)
    p["w1"] = xavier(ks[1], FEAT, FEAT, relu_gain)
    p["b1"] = jnp.zeros((FEAT,), jnp.float32)
    # skip layer (32+27) -> (1 density + 32 feat); 'first' init on density row
    p["w2d"] = xavier(ks[2], FEAT + D_IN3, 1, 1.0)
    p["w2f"] = xavier(ks[3], FEAT + D_IN3, FEAT, relu_gain)
    p["b2d"] = jnp.zeros((1,), jnp.float32)
    p["b2f"] = jnp.zeros((FEAT,), jnp.float32)
    p["wr0"] = xavier(ks[4], FEAT + D_INV, RGB_HID, relu_gain)
    p["br0"] = jnp.zeros((RGB_HID,), jnp.float32)
    p["wr1"] = xavier(ks[5], RGB_HID, 3, 1.0)     # 'all' init, gain 1
    p["br1"] = jnp.zeros((3,), jnp.float32)
    return p


def pack_params(p):
    """Pack everything into one (SLAB_ROWS, 128) f32 slab."""
    slab = np.zeros((SLAB_ROWS, SLAB_W), np.float32)

    def put(name, mat):
        r, nr, nc = SLAB_OFFS[name]
        mat = np.asarray(mat, np.float32)
        assert mat.shape == (nr, nc), (name, mat.shape, (nr, nc))
        slab[r:r + nr, :nc] = mat

    put("pe3", make_posenc_block(L_3D))
    put("pev", make_posenc_block(L_VIEW))
    put("l0", np.concatenate([np.asarray(p["w0"]).T,
                              np.asarray(p["b0"]).reshape(FEAT, 1)], axis=1))
    put("l1", np.concatenate([np.asarray(p["w1"]).T,
                              np.asarray(p["b1"]).reshape(FEAT, 1)], axis=1))
    # skip layer merged: output rows 0:32 = feat, row 32 = density
    w2cat_t = np.concatenate([np.asarray(p["w2f"]).T,
                              np.asarray(p["w2d"]).T], axis=0)          # (33, 59)
    b2cat = np.concatenate([np.asarray(p["b2f"]),
                            np.asarray(p["b2d"])]).reshape(FEAT + 1, 1)
    put("l2f", w2cat_t[:, :FEAT])
    put("l2p", np.concatenate([w2cat_t[:, FEAT:], b2cat], axis=1))
    wr0 = np.asarray(p["wr0"])                                          # (47, 16)
    put("lr0f", wr0[:FEAT].T)
    put("lr0r", np.concatenate([wr0[FEAT:].T,
                                np.asarray(p["br0"]).reshape(RGB_HID, 1)], axis=1))
    put("lr1", np.concatenate([np.asarray(p["wr1"]).T,
                               np.asarray(p["br1"]).reshape(3, 1)], axis=1))
    return jnp.asarray(slab)


# ---------------------------------------------------------------------------
# Pallas kernel: one tile of TM points, transposed (features x points) layout.
#   io_ref   : (8, TM)   rows 0-2 points xyz, rows 3-5 ray xyz
#   slab_ref : (SLAB_ROWS, 128) packed parameters
#   out_ref  : (4, TM)   rows 0-2 rgb, row 3 density
# ---------------------------------------------------------------------------
def nerf_kernel(io_ref, slab_ref, out_ref):
    f32 = jnp.float32
    bf16 = jnp.bfloat16

    def blk(name):
        r, nr, nc = SLAB_OFFS[name]
        return slab_ref[r:r + nr, 0:nc]

    def dot(w, x):
        # bf16 MXU matmul with f32 accumulation.
        return jnp.dot(w.astype(bf16), x.astype(bf16),
                       preferred_element_type=f32)

    def posenc(x, name):
        # x: (3, TM).  Projection runs on the VPU (K=3 is a waste of an MXU
        # pass); cos is folded into sin via a +pi/2 phase so sin runs once.
        pe = blk(name)                       # (D, 5)
        Pt0, Pt1, Pt2 = pe[:, 0:1], pe[:, 1:2], pe[:, 2:3]
        phase, idm = pe[:, 3:4], pe[:, 4:5]
        proj = (Pt0 * x[0:1, :] + Pt1 * x[1:2, :] + Pt2 * x[2:3, :])  # (D, TM)
        s = jnp.sin(proj + phase)
        return idm * proj + (1.0 - idm) * s   # identity rows keep raw coords

    pts = io_ref[0:3, :]                     # (3, TM)
    ray = io_ref[3:6, :]                     # (3, TM)

    pe3 = posenc(pts, "pe3")                 # (27, TM)
    pev = posenc(ray, "pev")                 # (15, TM)

    # mlp_feat
    l0 = blk("l0")
    feat = jnp.maximum(dot(l0[:, 0:D_IN3], pe3) + l0[:, D_IN3:D_IN3 + 1], 0.0)
    l1 = blk("l1")
    feat = jnp.maximum(dot(l1[:, 0:FEAT], feat) + l1[:, FEAT:FEAT + 1], 0.0)

    # skip layer: cat([feat, pe3]) @ W2  ==  W2f^T@feat + W2p^T@pe3 (merged so
    # density shares the feat matmul; density_activ == relu == feat relu).
    l2f = blk("l2f")                         # (33, 32)
    l2p = blk("l2p")                         # (33, 28)
    y = dot(l2f, feat) + dot(l2p[:, 0:D_IN3], pe3) + l2p[:, D_IN3:D_IN3 + 1]
    y = jnp.maximum(y, 0.0)                  # (33, TM)
    feat = y[0:FEAT, :]                      # (32, TM), sublane-aligned
    density = y[FEAT:FEAT + 1, :]            # (1, TM)

    # mlp_rgb (view-dependent)
    lr0f = blk("lr0f")                       # (16, 32)
    lr0r = blk("lr0r")                       # (16, 16)
    h = jnp.maximum(dot(lr0f, feat) + dot(lr0r[:, 0:D_INV], pev)
                    + lr0r[:, D_INV:D_INV + 1], 0.0)        # (16, TM)
    lr1 = blk("lr1")                         # (3, 17)
    logits = dot(lr1[:, 0:RGB_HID], h) + lr1[:, RGB_HID:RGB_HID + 1]
    rgb = jax.nn.sigmoid(logits)             # (3, TM)

    out_ref[0:3, :] = rgb
    out_ref[3:4, :] = density


# ---------------------------------------------------------------------------
# Wrapper: flatten leading dims, pack to lane-dense slabs, launch 1-D grid.
# ---------------------------------------------------------------------------
def nerf_forward(points_3D, ray_unit, slab, tm=2048):
    lead = points_3D.shape[:-1]
    M = int(np.prod(lead))

    # Tile over the lane (points) axis.  Default 2048 (sweep 2048-8192 on real
    # workloads); clamp down for tiny inputs so we don't pad excessively.
    # Note for v7x: with large M this naturally yields >=2 grid steps so the
    # parallel axis can be sharded across both TensorCores.
    tm = max(128, min(int(tm), pl.cdiv(M, 128) * 128))
    m_pad = pl.cdiv(M, tm) * tm

    pts = points_3D.reshape(M, 3).astype(jnp.float32)
    ray = ray_unit.reshape(M, 3).astype(jnp.float32)
    io = jnp.concatenate([pts.T, ray.T, jnp.zeros((2, M), jnp.float32)], axis=0)
    if m_pad != M:
        io = jnp.pad(io, ((0, 0), (0, m_pad - M)))           # (8, m_pad)

    out = pl.pallas_call(
        nerf_kernel,
        out_shape=jax.ShapeDtypeStruct((4, m_pad), jnp.float32),
        grid=(m_pad // tm,),
        in_specs=[pl.BlockSpec((8, tm), lambda i: (0, i)),
                  pl.BlockSpec((SLAB_ROWS, SLAB_W), lambda i: (0, 0))],
        out_specs=pl.BlockSpec((4, tm), lambda i: (0, i)),
        compiler_params=pltpu.CompilerParams(
            dimension_semantics=("parallel",)),
    )(io, slab)

    rgb = out[0:3, :M].T.reshape(*lead, 3)
    density = out[3, :M].reshape(*lead)
    return rgb, density


# ---------------------------------------------------------------------------
# Pure-JAX reference mirroring the PyTorch forward (f32 throughout).
# ---------------------------------------------------------------------------
def posenc_ref(x, L):
    freqs = (2.0 ** jnp.arange(L, dtype=jnp.float32)) * jnp.pi
    spec = x[..., None] * freqs                                   # (..., 3, L)
    enc = jnp.stack([jnp.sin(spec), jnp.cos(spec)], axis=-2)      # (..., 3, 2, L)
    enc = enc.reshape(*x.shape[:-1], -1)
    return jnp.concatenate([x, enc], axis=-1)


def nerf_ref(points_3D, ray_unit, p):
    pe = posenc_ref(points_3D, L_3D)
    f = jax.nn.relu(pe @ p["w0"] + p["b0"])
    f = jax.nn.relu(f @ p["w1"] + p["b1"])
    cat = jnp.concatenate([f, pe], axis=-1)
    den = jax.nn.relu(cat @ p["w2d"] + p["b2d"])[..., 0]
    f = jax.nn.relu(cat @ p["w2f"] + p["b2f"])
    re = posenc_ref(ray_unit, L_VIEW)
    h = jax.nn.relu(jnp.concatenate([f, re], axis=-1) @ p["wr0"] + p["br0"])
    rgb = jax.nn.sigmoid(h @ p["wr1"] + p["br1"])
    return rgb, den


if __name__ == "__main__":
    key = jax.random.PRNGKey(0)
    kp, kx, kr = jax.random.split(key, 3)
    params = init_params(kp)
    slab = pack_params(params)

    B, N = 2, 128   # e.g. 2 rays x 128 samples
    points_3D = jax.random.normal(kx, (B, N, 3), jnp.float32)
    ray = jax.random.normal(kr, (B, N, 3), jnp.float32)
    ray_unit = ray / jnp.linalg.norm(ray, axis=-1, keepdims=True)

    rgb, density = nerf_forward(points_3D, ray_unit, slab, tm=2048)
    jax.block_until_ready((rgb, density))

    rgb_ref, den_ref = nerf_ref(points_3D, ray_unit, params)
    assert rgb.shape == (B, N, 3) and density.shape == (B, N)
    # bf16 MXU inputs (f32 accumulation) -> slightly relaxed tolerance vs f32 ref.
    assert bool(jnp.allclose(rgb, rgb_ref, atol=2e-2, rtol=2e-2))
    assert bool(jnp.allclose(density, den_ref, atol=2e-2, rtol=2e-2))
    print("KERNEL_OK")
</pallas_src>

<mosaic_0001>
module attributes {stable_mosaic.version = 11 : i64} {
  func.func @nerf_kernel(%arg0: i32, %arg1: memref<8x256xf32, #tpu.memory_space<vmem>>, %arg2: memref<232x128xf32, #tpu.memory_space<vmem>>, %arg3: memref<4x256xf32, #tpu.memory_space<vmem>>) attributes {dimension_semantics = [#tpu.dimension_semantics<parallel>], iteration_bounds = array<i64: 1>, scalar_prefetch = 0 : i64, scratch_operands = 0 : i64, tpu.core_type = #tpu.core_type<tc>, window_params = [{transform_indices = @transform_0, window_bounds = array<i64: 8, 256>}, {pipeline_mode = #tpu.pipeline_mode<synchronous>, transform_indices = @transform_1, window_bounds = array<i64: 232, 128>}, {transform_indices = @transform_2, window_bounds = array<i64: 4, 256>}]} {
    %c0 = arith.constant 0 : index
    %c0_0 = arith.constant 0 : index
    %0 = vector.load %arg1[%c0, %c0_0] : memref<8x256xf32, #tpu.memory_space<vmem>>, vector<3x256xf32>
    %c3 = arith.constant 3 : index
    %c0_1 = arith.constant 0 : index
    %1 = vector.load %arg1[%c3, %c0_1] : memref<8x256xf32, #tpu.memory_space<vmem>>, vector<3x256xf32>
    %c0_2 = arith.constant 0 : index
    %c0_3 = arith.constant 0 : index
    %2 = vector.load %arg2[%c0_2, %c0_3] : memref<232x128xf32, #tpu.memory_space<vmem>>, vector<27x5xf32>
    %3 = vector.extract_strided_slice %2 {offsets = [0, 0], sizes = [27, 1], strides = [1, 1]} : vector<27x5xf32> to vector<27x1xf32>
    %4 = vector.extract_strided_slice %2 {offsets = [0, 1], sizes = [27, 1], strides = [1, 1]} : vector<27x5xf32> to vector<27x1xf32>
    %5 = vector.extract_strided_slice %2 {offsets = [0, 2], sizes = [27, 1], strides = [1, 1]} : vector<27x5xf32> to vector<27x1xf32>
    %6 = vector.extract_strided_slice %2 {offsets = [0, 3], sizes = [27, 1], strides = [1, 1]} : vector<27x5xf32> to vector<27x1xf32>
    %7 = vector.extract_strided_slice %2 {offsets = [0, 4], sizes = [27, 1], strides = [1, 1]} : vector<27x5xf32> to vector<27x1xf32>
    %8 = vector.extract_strided_slice %0 {offsets = [0, 0], sizes = [1, 256], strides = [1, 1]} : vector<3x256xf32> to vector<1x256xf32>
    %9 = vector.broadcast %3 : vector<27x1xf32> to vector<27x256xf32>
    %10 = vector.broadcast %8 : vector<1x256xf32> to vector<27x256xf32>
    %11 = arith.mulf %9, %10 : vector<27x256xf32>
    %12 = vector.extract_strided_slice %0 {offsets = [1, 0], sizes = [1, 256], strides = [1, 1]} : vector<3x256xf32> to vector<1x256xf32>
    %13 = vector.broadcast %4 : vector<27x1xf32> to vector<27x256xf32>
    %14 = vector.broadcast %12 : vector<1x256xf32> to vector<27x256xf32>
    %15 = arith.mulf %13, %14 : vector<27x256xf32>
    %16 = arith.addf %11, %15 : vector<27x256xf32>
    %17 = vector.extract_strided_slice %0 {offsets = [2, 0], sizes = [1, 256], strides = [1, 1]} : vector<3x256xf32> to vector<1x256xf32>
    %18 = vector.broadcast %5 : vector<27x1xf32> to vector<27x256xf32>
    %19 = vector.broadcast %17 : vector<1x256xf32> to vector<27x256xf32>
    %20 = arith.mulf %18, %19 : vector<27x256xf32>
    %21 = arith.addf %16, %20 : vector<27x256xf32>
    %22 = vector.broadcast %6 : vector<27x1xf32> to vector<27x256xf32>
    %23 = arith.addf %21, %22 : vector<27x256xf32>
    %24 = math.sin %23 : vector<27x256xf32>
    %25 = vector.broadcast %7 : vector<27x1xf32> to vector<27x256xf32>
    %26 = arith.mulf %25, %21 : vector<27x256xf32>
    %cst = arith.constant 1.000000e+00 : f32
    %27 = vector.broadcast %cst : f32 to vector<27x1xf32>
    %28 = arith.subf %27, %7 : vector<27x1xf32>
    %29 = vector.broadcast %28 : vector<27x1xf32> to vector<27x256xf32>
    %30 = arith.mulf %29, %24 : vector<27x256xf32>
    %31 = arith.addf %26, %30 : vector<27x256xf32>
    %c32 = arith.constant 32 : index
    %c0_4 = arith.constant 0 : index
    %32 = vector.load %arg2[%c32, %c0_4] : memref<232x128xf32, #tpu.memory_space<vmem>>, vector<15x5xf32>
    %33 = vector.extract_strided_slice %32 {offsets = [0, 0], sizes = [15, 1], strides = [1, 1]} : vector<15x5xf32> to vector<15x1xf32>
    %34 = vector.extract_strided_slice %32 {offsets = [0, 1], sizes = [15, 1], strides = [1, 1]} : vector<15x5xf32> to vector<15x1xf32>
    %35 = vector.extract_strided_slice %32 {offsets = [0, 2], sizes = [15, 1], strides = [1, 1]} : vector<15x5xf32> to vector<15x1xf32>
    %36 = vector.extract_strided_slice %32 {offsets = [0, 3], sizes = [15, 1], strides = [1, 1]} : vector<15x5xf32> to vector<15x1xf32>
    %37 = vector.extract_strided_slice %32 {offsets = [0, 4], sizes = [15, 1], strides = [1, 1]} : vector<15x5xf32> to vector<15x1xf32>
    %38 = vector.extract_strided_slice %1 {offsets = [0, 0], sizes = [1, 256], strides = [1, 1]} : vector<3x256xf32> to vector<1x256xf32>
    %39 = vector.broadcast %33 : vector<15x1xf32> to vector<15x256xf32>
    %40 = vector.broadcast %38 : vector<1x256xf32> to vector<15x256xf32>
    %41 = arith.mulf %39, %40 : vector<15x256xf32>
    %42 = vector.extract_strided_slice %1 {offsets = [1, 0], sizes = [1, 256], strides = [1, 1]} : vector<3x256xf32> to vector<1x256xf32>
    %43 = vector.broadcast %34 : vector<15x1xf32> to vector<15x256xf32>
    %44 = vector.broadcast %42 : vector<1x256xf32> to vector<15x256xf32>
    %45 = arith.mulf %43, %44 : vector<15x256xf32>
    %46 = arith.addf %41, %45 : vector<15x256xf32>
    %47 = vector.extract_strided_slice %1 {offsets = [2, 0], sizes = [1, 256], strides = [1, 1]} : vector<3x256xf32> to vector<1x256xf32>
    %48 = vector.broadcast %35 : vector<15x1xf32> to vector<15x256xf32>
    %49 = vector.broadcast %47 : vector<1x256xf32> to vector<15x256xf32>
    %50 = arith.mulf %48, %49 : vector<15x256xf32>
    %51 = arith.addf %46, %50 : vector<15x256xf32>
    %52 = vector.broadcast %36 : vector<15x1xf32> to vector<15x256xf32>
    %53 = arith.addf %51, %52 : vector<15x256xf32>
    %54 = math.sin %53 : vector<15x256xf32>
    %55 = vector.broadcast %37 : vector<15x1xf32> to vector<15x256xf32>
    %56 = arith.mulf %55, %51 : vector<15x256xf32>
    %cst_5 = arith.constant 1.000000e+00 : f32
    %57 = vector.broadcast %cst_5 : f32 to vector<15x1xf32>
    %58 = arith.subf %57, %37 : vector<15x1xf32>
    %59 = vector.broadcast %58 : vector<15x1xf32> to vector<15x256xf32>
    %60 = arith.mulf %59, %54 : vector<15x256xf32>
    %61 = arith.addf %56, %60 : vector<15x256xf32>
    %c48 = arith.constant 48 : index
    %c0_6 = arith.constant 0 : index
    %62 = vector.load %arg2[%c48, %c0_6] : memref<232x128xf32, #tpu.memory_space<vmem>>, vector<32x28xf32>
    %63 = vector.extract_strided_slice %62 {offsets = [0, 0], sizes = [32, 27], strides = [1, 1]} : vector<32x28xf32> to vector<32x27xf32>
    %64 = arith.truncf %63 : vector<32x27xf32> to vector<32x27xbf16>
    %65 = arith.truncf %31 : vector<27x256xf32> to vector<27x256xbf16>
    %cst_7 = arith.constant dense<0.000000e+00> : vector<32x256xf32>
    %66 = tpu.matmul %64, %65, %cst_7 {dimension_numbers = #tpu.dot_dimension_numbers<[1], [0], [0], [1], [0, 0, 1, 1], [], []>} : vector<32x27xbf16>, vector<27x256xbf16>, vector<32x256xf32> -> vector<32x256xf32>
    %67 = vector.extract_strided_slice %62 {offsets = [0, 27], sizes = [32, 1], strides = [1, 1]} : vector<32x28xf32> to vector<32x1xf32>
    %68 = vector.broadcast %67 : vector<32x1xf32> to vector<32x256xf32>
    %69 = arith.addf %66, %68 : vector<32x256xf32>
    %cst_8 = arith.constant 0.000000e+00 : f32
    %70 = vector.broadcast %cst_8 : f32 to vector<32x256xf32>
    %71 = arith.maximumf %69, %70 : vector<32x256xf32>
    %c80 = arith.constant 80 : index
    %c0_9 = arith.constant 0 : index
    %72 = vector.load %arg2[%c80, %c0_9] : memref<232x128xf32, #tpu.memory_space<vmem>>, vector<32x33xf32>
    %73 = vector.extract_strided_slice %72 {offsets = [0, 0], sizes = [32, 32], strides = [1, 1]} : vector<32x33xf32> to vector<32x32xf32>
    %74 = arith.truncf %73 : vector<32x32xf32> to vector<32x32xbf16>
    %75 = arith.truncf %71 : vector<32x256xf32> to vector<32x256xbf16>
    %cst_10 = arith.constant dense<0.000000e+00> : vector<32x256xf32>
    %76 = tpu.matmul %74, %75, %cst_10 {dimension_numbers = #tpu.dot_dimension_numbers<[1], [0], [0], [1], [0, 0, 1, 1], [], []>} : vector<32x32xbf16>, vector<32x256xbf16>, vector<32x256xf32> -> vector<32x256xf32>
    %77 = vector.extract_strided_slice %72 {offsets = [0, 32], sizes = [32, 1], strides = [1, 1]} : vector<32x33xf32> to vector<32x1xf32>
    %78 = vector.broadcast %77 : vector<32x1xf32> to vector<32x256xf32>
    %79 = arith.addf %76, %78 : vector<32x256xf32>
    %cst_11 = arith.constant 0.000000e+00 : f32
    %80 = vector.broadcast %cst_11 : f32 to vector<32x256xf32>
    %81 = arith.maximumf %79, %80 : vector<32x256xf32>
    %c112 = arith.constant 112 : index
    %c0_12 = arith.constant 0 : index
    %82 = vector.load %arg2[%c112, %c0_12] : memref<232x128xf32, #tpu.memory_space<vmem>>, vector<33x32xf32>
    %c152 = arith.constant 152 : index
    %c0_13 = arith.constant 0 : index
    %83 = vector.load %arg2[%c152, %c0_13] : memref<232x128xf32, #tpu.memory_space<vmem>>, vector<33x28xf32>
    %84 = arith.truncf %82 : vector<33x32xf32> to vector<33x32xbf16>
    %85 = arith.truncf %81 : vector<32x256xf32> to vector<32x256xbf16>
    %cst_14 = arith.constant dense<0.000000e+00> : vector<33x256xf32>
    %86 = tpu.matmul %84, %85, %cst_14 {dimension_numbers = #tpu.dot_dimension_numbers<[1], [0], [0], [1], [0, 0, 1, 1], [], []>} : vector<33x32xbf16>, vector<32x256xbf16>, vector<33x256xf32> -> vector<33x256xf32>
    %87 = vector.extract_strided_slice %83 {offsets = [0, 0], sizes = [33, 27], strides = [1, 1]} : vector<33x28xf32> to vector<33x27xf32>
    %88 = arith.truncf %87 : vector<33x27xf32> to vector<33x27xbf16>
    %89 = arith.truncf %31 : vector<27x256xf32> to vector<27x256xbf16>
    %cst_15 = arith.constant dense<0.000000e+00> : vector<33x256xf32>
    %90 = tpu.matmul %88, %89, %cst_15 {dimension_numbers = #tpu.dot_dimension_numbers<[1], [0], [0], [1], [0, 0, 1, 1], [], []>} : vector<33x27xbf16>, vector<27x256xbf16>, vector<33x256xf32> -> vector<33x256xf32>
    %91 = arith.addf %86, %90 : vector<33x256xf32>
    %92 = vector.extract_strided_slice %83 {offsets = [0, 27], sizes = [33, 1], strides = [1, 1]} : vector<33x28xf32> to vector<33x1xf32>
    %93 = vector.broadcast %92 : vector<33x1xf32> to vector<33x256xf32>
    %94 = arith.addf %91, %93 : vector<33x256xf32>
    %cst_16 = arith.constant 0.000000e+00 : f32
    %95 = vector.broadcast %cst_16 : f32 to vector<33x256xf32>
    %96 = arith.maximumf %94, %95 : vector<33x256xf32>
    %97 = vector.extract_strided_slice %96 {offsets = [0, 0], sizes = [32, 256], strides = [1, 1]} : vector<33x256xf32> to vector<32x256xf32>
    %98 = vector.extract_strided_slice %96 {offsets = [32, 0], sizes = [1, 256], strides = [1, 1]} : vector<33x256xf32> to vector<1x256xf32>
    %c192 = arith.constant 192 : index
    %c0_17 = arith.constant 0 : index
    %99 = vector.load %arg2[%c192, %c0_17] : memref<232x128xf32, #tpu.memory_space<vmem>>, vector<16x32xf32>
    %c208 = arith.constant 208 : index
    %c0_18 = arith.constant 0 : index
    %100 = vector.load %arg2[%c208, %c0_18] : memref<232x128xf32, #tpu.memory_space<vmem>>, vector<16x16xf32>
    %101 = arith.truncf %99 : vector<16x32xf32> to vector<16x32xbf16>
    %102 = arith.truncf %97 : vector<32x256xf32> to vector<32x256xbf16>
    %cst_19 = arith.constant dense<0.000000e+00> : vector<16x256xf32>
    %103 = tpu.matmul %101, %102, %cst_19 {dimension_numbers = #tpu.dot_dimension_numbers<[1], [0], [0], [1], [0, 0, 1, 1], [], []>} : vector<16x32xbf16>, vector<32x256xbf16>, vector<16x256xf32> -> vector<16x256xf32>
    %104 = vector.extract_strided_slice %100 {offsets = [0, 0], sizes = [16, 15], strides = [1, 1]} : vector<16x16xf32> to vector<16x15xf32>
    %105 = arith.truncf %104 : vector<16x15xf32> to vector<16x15xbf16>
    %106 = arith.truncf %61 : vector<15x256xf32> to vector<15x256xbf16>
    %cst_20 = arith.constant dense<0.000000e+00> : vector<16x256xf32>
    %107 = tpu.matmul %105, %106, %cst_20 {dimension_numbers = #tpu.dot_dimension_numbers<[1], [0], [0], [1], [0, 0, 1, 1], [], []>} : vector<16x15xbf16>, vector<15x256xbf16>, vector<16x256xf32> -> vector<16x256xf32>
    %108 = arith.addf %103, %107 : vector<16x256xf32>
    %109 = vector.extract_strided_slice %100 {offsets = [0, 15], sizes = [16, 1], strides = [1, 1]} : vector<16x16xf32> to vector<16x1xf32>
    %110 = vector.broadcast %109 : vector<16x1xf32> to vector<16x256xf32>
    %111 = arith.addf %108, %110 : vector<16x256xf32>
    %cst_21 = arith.constant 0.000000e+00 : f32
    %112 = vector.broadcast %cst_21 : f32 to vector<16x256xf32>
    %113 = arith.maximumf %111, %112 : vector<16x256xf32>
    %c224 = arith.constant 224 : index
    %c0_22 = arith.constant 0 : index
    %114 = vector.load %arg2[%c224, %c0_22] : memref<232x128xf32, #tpu.memory_space<vmem>>, vector<3x17xf32>
    %115 = vector.extract_strided_slice %114 {offsets = [0, 0], sizes = [3, 16], strides = [1, 1]} : vector<3x17xf32> to vector<3x16xf32>
    %116 = arith.truncf %115 : vector<3x16xf32> to vector<3x16xbf16>
    %117 = arith.truncf %113 : vector<16x256xf32> to vector<16x256xbf16>
    %cst_23 = arith.constant dense<0.000000e+00> : vector<3x256xf32>
    %118 = tpu.matmul %116, %117, %cst_23 {dimension_numbers = #tpu.dot_dimension_numbers<[1], [0], [0], [1], [0, 0, 1, 1], [], []>} : vector<3x16xbf16>, vector<16x256xbf16>, vector<3x256xf32> -> vector<3x256xf32>
    %119 = vector.extract_strided_slice %114 {offsets = [0, 16], sizes = [3, 1], strides = [1, 1]} : vector<3x17xf32> to vector<3x1xf32>
    %120 = vector.broadcast %119 : vector<3x1xf32> to vector<3x256xf32>
    %121 = arith.addf %118, %120 : vector<3x256xf32>
    %122 = arith.negf %121 : vector<3x256xf32>
    %123 = math.exp %122 : vector<3x256xf32>
    %cst_24 = arith.constant 1.000000e+00 : f32
    %124 = vector.broadcast %cst_24 : f32 to vector<3x256xf32>
    %125 = arith.addf %124, %123 : vector<3x256xf32>
    %126 = arith.divf %124, %125 : vector<3x256xf32>
    %c0_25 = arith.constant 0 : index
    %c0_26 = arith.constant 0 : index
    %127 = vector.load %arg3[%c0_25, %c0_26] : memref<4x256xf32, #tpu.memory_space<vmem>>, vector<3x256xf32>
    tpu.vector_store %arg3[%c0_25, %c0_26], %126 {strides = array<i32>} : memref<4x256xf32, #tpu.memory_space<vmem>>, vector<3x256xf32>,
    %c3_27 = arith.constant 3 : index
    %c0_28 = arith.constant 0 : index
    %128 = vector.load %arg3[%c3_27, %c0_28] : memref<4x256xf32, #tpu.memory_space<vmem>>, vector<1x256xf32>
    tpu.vector_store %arg3[%c3_27, %c0_28], %98 {strides = array<i32>} : memref<4x256xf32, #tpu.memory_space<vmem>>, vector<1x256xf32>,
    return
  }
  func.func @transform_0(%arg0: i32) -> (i32, i32) {
    %c0_i32 = arith.constant 0 : i32
    %c0_i32_0 = arith.constant 0 : i32
    return %c0_i32, %arg0 : i32, i32
  }
  func.func @transform_1(%arg0: i32) -> (i32, i32) {
    %c0_i32 = arith.constant 0 : i32
    %c0_i32_0 = arith.constant 0 : i32
    %c0_i32_1 = arith.constant 0 : i32
    return %c0_i32, %c0_i32_0 : i32, i32
  }
  func.func @transform_2(%arg0: i32) -> (i32, i32) {
    %c0_i32 = arith.constant 0 : i32
    %c0_i32_0 = arith.constant 0 : i32
    return %c0_i32, %arg0 : i32, i32
  }
}

</mosaic_0001>

<bundles_post_ra>
// kernel: tpu_custom_call.1
= control target key start
LH: loop header
LB: loop body
LE: loop exit
PB: predicated region body
PF: predicated region fallthrough
CT: control target
= control target key end

     0   :  { %7 = vsyncpa [#allocation3], 0  ;;  %s4175_s0 = inlined_call_operand.hbm [shape: f32[8,256], index: 0, kind: input, shape index: {}]   ;;  %s4176_s1 = inlined_call_operand.hbm [shape: f32[232,128], index: 1, kind: input, shape index: {}]   ;;  %s4177_s2 = inlined_call_operand.hbm [shape: f32[4,256], index: 2, kind: output, shape index: {}]  }
   0x1   :  { %8 = vsyncpa [#allocation6], 0 }
   0x2   :  { %9 = vsyncpa [#allocation4], 0  ;;  %s2575_s9 = smov [#allocation2]   ;;  %s2576_s11 = smov [#allocation5]  }
   0x3   :  { %s16_s10 = sshll.u32 %s2575_s9, 4  ;;  %s25_s12 = sshll.u32 %s2576_s11, 4  ;;  %s17_s10 = int_to_ptr.vmem [resolvable:$true] %s16_s10  ;;  %s2612_s12 = int_to_ptr.vmem [resolvable:$true] %s25_s12 }
   0x4   :  { %s2503_s15 = scalar_lea.hbm %s4175_s0, 256 }
   0x5   :  { %p2504_p0 = scmp.ne.s32.totalorder %s4175_s0, %s2503_s15  ;;  %p2507_p1 = scmp.lt.u32.totalorder %s2503_s15, %s4175_s0 }
   0x7   :  { %p2509_p2 = pnand %p2507_p1, %p2504_p0 }
   0x9   :  { %2512 = shalt.err (!%p2509_p2)
}
   0xa   :  { %s2513_s20 = scalar_lea.vmem %s17_s10, 256  ;;  %p2518_p4 = scmp.lt.s32.totalorder %s17_s10, %s17_s10 }
   0xb   :  { %p2514_p3 = scmp.ne.s32.totalorder %s17_s10, %s2513_s20  ;;  %p2519_p5 = scmp.lt.s32.totalorder %s2513_s20, %s2513_s20 }
   0xd   :  { %p2520_p6 = por %p2519_p5, %p2518_p4 }
   0xf   :  { %p2521_p7 = pnand %p2520_p6, %p2514_p3 }
  0x11   :  { %2524 = shalt.err (!%p2521_p7)
}
  0x12   :  { %19 = dma.hbm_to_vmem [thread:$0]  %s4175_s0, 256, %s17_s10, [#allocation3]  }
  0x13   :  { %s2525_s25 = scalar_lea.hbm %s4176_s1, 3712 }
  0x14   :  { %p2526_p8 = scmp.ne.s32.totalorder %s4176_s1, %s2525_s25  ;;  %p2529_p9 = scmp.lt.u32.totalorder %s2525_s25, %s4176_s1 }
  0x16   :  { %p2531_p10 = pnand %p2529_p9, %p2526_p8 }
  0x18   :  { %2534 = shalt.err (!%p2531_p10)
}
  0x19   :  { %s2535_s30 = scalar_lea.vmem %s2612_s12, 3712  ;;  %p2540_p12 = scmp.lt.s32.totalorder %s2612_s12, %s2612_s12 }
  0x1a   :  { %p2536_p11 = scmp.ne.s32.totalorder %s2612_s12, %s2535_s30  ;;  %p2541_p13 = scmp.lt.s32.totalorder %s2535_s30, %s2535_s30 }
  0x1c   :  { %p2542_p0 = por %p2541_p13, %p2540_p12 }
  0x1e   :  { %p2543_p1 = pnand %p2542_p0, %p2536_p11 }
  0x20   :  { %2546 = shalt.err (!%p2543_p1)
}
  0x21   :  { %s2577_s0 = smov 128   ;;  %s2578_s3 = smov 8  }
  0x22   :  { %31 = dma.hbm_to_vmem [thread:$0]  %s4176_s1, 3712, %s2612_s12, [#allocation6], %s2577_s0, %s2577_s0, %s2578_s3  }
  0x23   :  { %2569 = dma.done.wait [#allocation3], 256  }
  0x24   :  { %2570 = vsyncadd [#allocation3], 4294967040 }
  0x25   :  { %2571 = dma.done.wait [#allocation6], 3712  }
  0x26   :  { %2572 = vsyncadd [#allocation6], 4294963584  ;;  %v4184_v0 = vmov 1   ;;  %v4186_v1 = vmov 0   ;;  %v43_v2 = vld [vmem:[#allocation5] sm:$0xff]  ;;  %v44_v3 = vld [vmem:[#allocation5 + $0x8] sm:$0xff]  ;;  %v4178_v13 = vlaneseq }
  0x27   :  { %2416 = vset.pattern.permute.xlu1 %v4184_v0  ;;  %2415 = vset.pattern.permute.xlu0 %v4186_v1  ;;  %v45_v4 = vld [vmem:[#allocation5 + $0x10] sm:$0xff]  ;;  %v46_v5 = vld [vmem:[#allocation5 + $0x18] sm:$0x7]  ;;  %v4179_v6 = vmov 2   ;;  %v4182_v7 = vmov 3   ;;  %v4180_v8 = vmov 4  }
  0x28   :  { %1694 = vmatprep.mubr.bf16.mxu1 %v4186_v1  ;;  %1882 = vmatprep.mubr.bf16.mxu0 %v4186_v1  ;;  %v1045_v9 = vsub.f32 1.0, %v45_v4  ;;  %v1043_v10 = vsub.f32 1.0, %v43_v2  ;;  %v1044_v11 = vsub.f32 1.0, %v44_v3  ;;  %v1046_v12 = vsub.f32 1.0, %v46_v5  ;;  %v40_v18 = vld [vmem:[#allocation2 + $0x8] sm:$0x7] }
  0x29   :  { %84 = vperm.xlu1 %2416, %v43_v2   ;;  %49 = vperm.xlu0 %2415, %v43_v2   ;;  %v2657_v14 = vshrl.u32 %v4178_v13, 7  ;;  %v39_v22 = vld [vmem:[#allocation2] sm:$0x7]  ;;  %s2596_s1 = smov [#allocation7]  }
  0x2a   :  { %s2260_s6 = sshll.u32 %s2596_s1, 4  ;;  %s2261_s6 = int_to_ptr.vmem [resolvable:$true] %s2260_s6 }
  0x2b   :  { %4225 = vst [vmem:[#allocation11_spill] sm:$0xff] %v2657_v14  ;;  %v69_v17 = vsub.s32 0, %v2657_v14  ;;  %v101_v21 = vsub.s32 1, %v2657_v14  ;;  %v141_v27 = vsub.s32 2, %v2657_v14  ;;  %s2547_s7 = scalar_lea.vmem %s2261_s6, 128  ;;  %p2552_p3 = scmp.lt.s32.totalorder %s2261_s6, %s2261_s6 }
  0x2c   :  { %p2548_p2 = scmp.ne.s32.totalorder %s2261_s6, %s2547_s7  ;;  %p2553_p4 = scmp.lt.s32.totalorder %s2547_s7, %s2547_s7 }
  0x2d   :  { %88 = vperm.xlu1 %2416, %v44_v3   ;;  %54 = vperm.xlu0 %2415, %v44_v3   ;;  %v2665_v23 = vrot.slane %v40_v18, %v69_v17  ;;  %v102_v28 = vrot.slane %v39_v22, %v101_v21  ;;  %v2670_v30 = vrot.slane %v40_v18, %v101_v21 }
  0x2e   :  { %v70_v31 = vrot.slane %v39_v22, %v69_v17  ;;  %v142_v33 = vrot.slane %v39_v22, %v141_v27  ;;  %v2672_v34 = vrot.slane %v40_v18, %v141_v27  ;;  %p2554_p5 = por %p2553_p4, %p2552_p3 }
  0x30   :  { %p2555_p6 = pnand %p2554_p5, %p2548_p2 }
  0x31   :  { %2417 = vset.pattern.permute.xlu1 %v4186_v1  ;;  %59 = vperm.xlu0 %2415, %v45_v4  }
  0x32   :  { %64 = vperm.xlu1 %2417, %v46_v5  }
  0x35   :  { %2418 = vset.pattern.permute.xlu0 %v4184_v0 }
  0x36   :  { %2419 = vset.pattern.permute.xlu1 %v4184_v0  ;;  %92 = vperm.xlu0 %2418, %v45_v4  }
  0x37   :  { %96 = vperm.xlu1 %2419, %v46_v5  }
  0x3a   :  { %2421 = vset.pattern.permute.xlu0 %v4179_v6 }
  0x3b   :  { %2420 = vset.pattern.permute.xlu1 %v4179_v6  ;;  %128 = vperm.xlu0 %2421, %v44_v3  }
  0x3c   :  { %124 = vperm.xlu1 %2420, %v43_v2  }
  0x3f   :  { %2422 = vset.pattern.permute.xlu0 %v4182_v7 }
  0x40   :  { %132 = vperm.xlu1 %2420, %v45_v4   ;;  %164 = vperm.xlu0 %2422, %v43_v2  }
  0x44   :  { %136 = vperm.xlu1 %2420, %v46_v5   ;;  %176 = vperm.xlu0 %2422, %v46_v5  }
  0x48   :  { %2423 = vset.pattern.permute.xlu1 %v4182_v7  ;;  %2425 = vset.pattern.permute.xlu0 %v4180_v8 }
  0x49   :  { %168 = vperm.xlu1 %2423, %v44_v3   ;;  %1024 = vperm.xlu0 %2425, %v44_v3  }
  0x4d   :  { %172 = vperm.xlu1 %2423, %v45_v4   ;;  %1028 = vperm.xlu0 %2425, %v45_v4  }
  0x51   :  { %2424 = vset.pattern.permute.xlu1 %v4180_v8  ;;  %1059 = vperm.xlu0 %2425, %v1045_v9  }
  0x52   :  { %1020 = vperm.xlu1 %2424, %v43_v2  }
  0x56   :  { %1049 = vperm.xlu1 %2424, %v1043_v10  }
  0x5a   :  { %1054 = vperm.xlu1 %2424, %v1044_v11  }
  0x5e   :  { %1032 = vperm.xlu1 %2424, %v46_v5  }
  0x62   :  { %1064 = vperm.xlu1 %2424, %v1046_v12  }
  0xa8   :  { %v85_v15 = vpop.permute.xlu1 %84  ;;  %v50_v16 = vpop.permute.xlu0 %49 }
  0xa9   :  { %v107_v35 = vmul.f32 %v102_v28, %v85_v15  ;;  %v108_v40 = vmul.f32 %v2670_v30, %v85_v15  ;;  %v75_v44 = vmul.f32 %v70_v31, %v50_v16  ;;  %v76_v45 = vmul.f32 %v2665_v23, %v50_v16 }
  0xab   :  { %v115_v52 = vadd.f32 %v107_v35, %v75_v44  ;;  %v116_v53 = vadd.f32 %v108_v40, %v76_v45 }
  0xac   :  { %v2660_v19 = vpop.permute.xlu1 %88  ;;  %v2662_v20 = vpop.permute.xlu0 %54 }
  0xad   :  { %v109_v18 = vmul.f32 %v102_v28, %v2660_v19  ;;  %v77_v21 = vmul.f32 %v70_v31, %v2662_v20 }
  0xb0   :  { %v60_v24 = vpop.permute.xlu0 %59 }
  0xb1   :  { %v65_v25 = vpop.permute.xlu1 %64  ;;  %v80_v26 = vmul.f32 %v2665_v23, %v60_v24  ;;  %v79_v36 = vmul.f32 %v70_v31, %v60_v24 }
  0xb2   :  { %v82_v29 = vmul.f32 %v2665_v23, %v65_v25  ;;  %v81_v41 = vmul.f32 %v70_v31, %v65_v25 }
  0xb5   :  { %v93_v32 = vpop.permute.xlu0 %92 }
  0xb6   :  { %v111_v37 = vmul.f32 %v102_v28, %v93_v32  ;;  %v112_v38 = vmul.f32 %v2670_v30, %v93_v32  ;;  %v97_v39 = vpop.permute.xlu1 %96 }
  0xb7   :  { %v113_v42 = vmul.f32 %v102_v28, %v97_v39  ;;  %v114_v43 = vmul.f32 %v2670_v30, %v97_v39 }
  0xb8   :  { %v119_v46 = vadd.f32 %v111_v37, %v79_v36  ;;  %v120_v47 = vadd.f32 %v112_v38, %v80_v26 }
  0xb9   :  { %v121_v48 = vadd.f32 %v113_v42, %v81_v41  ;;  %v122_v49 = vadd.f32 %v114_v43, %v82_v29  ;;  %v117_v29 = vadd.f32 %v109_v18, %v77_v21 }
  0xba   :  { %v129_v50 = vpop.permute.xlu0 %128 }
  0xbb   :  { %v125_v51 = vpop.permute.xlu1 %124  ;;  %v149_v25 = vmul.f32 %v142_v33, %v129_v50 }
  0xbc   :  { %v147_v54 = vmul.f32 %v142_v33, %v125_v51  ;;  %v148_v55 = vmul.f32 %v2672_v34, %v125_v51 }
  0xbd   :  { %v157_v38 = vadd.f32 %v149_v25, %v117_v29 }
  0xbe   :  { %v2679_v56 = vadd.f32 %v147_v54, %v115_v52  ;;  %v2681_v57 = vadd.f32 %v148_v55, %v116_v53  ;;  %v150_v52 = vmul.f32 %v2672_v34, %v129_v50 }
  0xbf   :  { %v133_v58 = vpop.permute.xlu1 %132  ;;  %v165_v59 = vpop.permute.xlu0 %164 }
  0xc0   :  { %v151_v60 = vmul.f32 %v142_v33, %v133_v58  ;;  %v152_v61 = vmul.f32 %v2672_v34, %v133_v58  ;;  %v2685_v62 = vadd.f32 %v165_v59, %v2679_v56  ;;  %v2688_v63 = vadd.f32 %v165_v59, %v2681_v57 }
  0xc2   :  { %v190_v2 = vand.u32 2139095040, %v2685_v62  ;;  %v294_v3 = vand.u32 2139095040, %v2688_v63  ;;  %v2692_v5 = vadd.f32 %v151_v60, %v119_v46  ;;  %v2694_v9 = vadd.f32 %v152_v61, %v120_v47 }
  0xc3   :  { %v137_v4 = vpop.permute.xlu1 %136  ;;  %v177_v26 = vpop.permute.xlu0 %176  ;;  %v110_v47 = vmul.f32 %v2670_v30, %v2660_v19  ;;  %v4189_v54 = vand.u32 2147483647, %v2685_v62  ;;  %v4198_v19 = vmov 920167782  }
  0xc4   :  { %4226 = vst [vmem:[#allocation12_spill] sm:$0xff] %v2692_v5  ;;  %4227 = vst [vmem:[#allocation13_spill] sm:$0xff] %v2694_v9  ;;  %v153_v10 = vmul.f32 %v142_v33, %v137_v4  ;;  %v154_v11 = vmul.f32 %v2672_v34, %v137_v4  ;;  %v191_v12 = vshrl.u32 %v190_v2, 23  ;;  %v295_v17 = vshrl.u32 %v294_v3, 23 }
  0xc5   :  { %v2736_v30 = vand.u32 8388607, %v4189_v54  ;;  %v4190_v34 = vmov 1326507024   ;;  %v4188_v3 = vand.u32 2147483647, %v2688_v63 }
  0xc6   :  { %v2697_v15 = vadd.f32 %v153_v10, %v121_v48  ;;  %v2699_v16 = vadd.f32 %v154_v11, %v122_v49  ;;  %v2270_v22 = vadd.s32 4294967169, %v191_v12  ;;  %v2274_v24 = vadd.s32 4294967169, %v295_v17 }
  0xc7   :  { %v78_v48 = vmul.f32 %v2665_v23, %v2662_v20  ;;  %v4205_v4 = vmov 2102212464  }
  0xc8   :  { %4228 = vst [vmem:[#allocation14_spill] sm:$0xff] %v2697_v15  ;;  %4229 = vst [vmem:[#allocation15_spill] sm:$0xff] %v2699_v16  ;;  %v2704_v27 = vadd.f32 %v177_v26, %v2697_v15  ;;  %v197_v32 = vadd.s32 1, %v2270_v22  ;;  %v2707_v35 = vadd.f32 %v177_v26, %v2699_v16  ;;  %v301_v36 = vadd.s32 1, %v2274_v24  ;;  %v169_v37 = vpop.permute.xlu1 %168 }
  0xc9   :  { %v2711_v31 = vadd.f32 %v169_v37, %v157_v38  ;;  %v118_v59 = vadd.f32 %v110_v47, %v78_v48  ;;  %v4235_v16 = vmov 920167782  }
  0xca   :  { %4230 = vst [vmem:[#allocation16_spill] sm:$0xff] %v2704_v27  ;;  %v814_v39 = vand.u32 2139095040, %v2704_v27  ;;  %vm198_vm0 = vcmp.gt.s32.totalorder %v197_v32, 0  ;;  %v918_v28 = vand.u32 2139095040, %v2707_v35  ;;  %vm302_vm1 = vcmp.gt.s32.totalorder %v301_v36, 0 }
  0xcb   :  { %4231 = vst [vmem:[#allocation17_spill] sm:$0xff] %v2711_v31  ;;  %v199_v33 = vsel %vm198_vm0, %v197_v32, 0  ;;  %v303_v41 = vsel %vm302_vm1, %v301_v36, 0  ;;  %v398_v43 = vand.u32 2139095040, %v2711_v31  ;;  %v2732_v23 = vadd.f32 %v150_v52, %v118_v59 }
  0xcc   :  { %v815_v40 = vshrl.u32 %v814_v39, 23  ;;  %v919_v42 = vshrl.u32 %v918_v28, 23  ;;  %v2714_v44 = vand.u32 31, %v199_v33  ;;  %v2716_v45 = vand.u32 31, %v303_v41  ;;  %v2764_v28 = vpop.permute.xlu0 %1024  ;;  %v173_v52 = vpop.permute.xlu1 %172 }
  0xcd   :  { %v399_v51 = vshrl.u32 %v398_v43, 23  ;;  %v2747_v17 = vshrl.u32 %v199_v33, 5  ;;  %v2754_v22 = vadd.f32 %v169_v37, %v2732_v23  ;;  %v2758_v25 = vshrl.u32 %v303_v41, 5 }
  0xce   :  { %v2294_v46 = vadd.s32 4294967169, %v815_v40  ;;  %v2298_v49 = vadd.s32 4294967169, %v919_v42  ;;  %v2724_v53 = vsub.s32 32, %v2714_v44  ;;  %v2728_v55 = vsub.s32 32, %v2716_v45 }
  0xcf   :  { %v2278_v61 = vadd.s32 4294967169, %v399_v51  ;;  %v213_v10 = vshll.u32 %v4205_v4, %v2714_v44  ;;  %v216_v18 = vshll.u32 %v4198_v19, %v2714_v44  ;;  %v317_v21 = vshll.u32 %v4205_v4, %v2716_v45 }
  0xd0   :  { %v821_v58 = vadd.s32 1, %v2294_v46  ;;  %v925_v60 = vadd.s32 1, %v2298_v49  ;;  %v214_v20 = vshrl.u32 %v4198_v19, %v2724_v53  ;;  %v217_v50 = vshrl.u32 %v4190_v34, %v2724_v53 }
  0xd1   :  { %v318_v2 = vshrl.u32 %v4198_v19, %v2728_v55  ;;  %v321_v11 = vshrl.u32 %v4190_v34, %v2728_v55  ;;  %v405_v12 = vadd.s32 1, %v2278_v61  ;;  %v320_v26 = vshll.u32 %v4198_v19, %v2716_v45 }
  0xd2   :  { %vm822_vm2 = vcmp.gt.s32.totalorder %v821_v58, 0  ;;  %vm926_vm3 = vcmp.gt.s32.totalorder %v925_v60, 0  ;;  %v2756_v24 = vor.u32 %v214_v20, %v213_v10  ;;  %v218_v32 = vor.u32 %v217_v50, %v216_v18 }
  0xd3   :  { %v823_v29 = vsel %vm822_vm2, %v821_v58, 0  ;;  %v2762_v36 = vor.u32 %v318_v2, %v317_v21  ;;  %v927_v39 = vsel %vm926_vm3, %v925_v60, 0  ;;  %v322_v33 = vor.u32 %v321_v11, %v320_v26 }
  0xd4   :  { %vm406_vm4 = vcmp.gt.s32.totalorder %v405_v12, 0  ;;  %v195_v40 = vor.u32 8388608, %v2736_v30  ;;  %vm222_vm5 = vcmp.lt.s32.totalorder %v2747_v17, 4  ;;  %v2768_v37 = vand.u32 31, %v823_v29 }
  0xd5   :  { %v502_v41 = vand.u32 2139095040, %v2754_v22  ;;  %v2773_v42 = vand.u32 8388607, %v4188_v3  ;;  %v228_v43 = vsel %vm222_vm5, %v2756_v24, 920167782  ;;  %vm326_vm6 = vcmp.lt.s32.totalorder %v2758_v25, 4 }
  0xd6   :  { %v2779_v46 = vand.u32 31, %v927_v39  ;;  %v2782_v47 = vmul.f32 %v2764_v28, %v157_v38  ;;  %v232_v48 = vsel %vm222_vm5, %v218_v32, 1326507024  ;;  %v2789_v49 = vsel %vm326_vm6, %v2762_v36, 920167782 }
  0xd7   :  { %v407_v51 = vsel %vm406_vm4, %v405_v12, 0  ;;  %v4194_v58 = vmov 2475754826   ;;  %v2795_v60 = vsel %vm326_vm6, %v322_v33, 1326507024  ;;  %v2797_v38 = vshrl.u32 %v823_v29, 5 }
  0xd8   :  { %4232 = vst [vmem:[#allocation18_spill] sm:$0xff] %v2782_v47  ;;  %v205_v59 = vshrl.u32 %v4194_v58, %v2724_v53  ;;  %v2799_v61 = vshrl.u32 %v927_v39, 5  ;;  %v4192_v20 = vmov 2131351028   ;;  %v2804_v50 = vsub.s32 32, %v2768_v37 }
  0xd9   :  { %v208_v30 = vshrl.u32 %v4192_v20, %v2724_v53  ;;  %v503_v2 = vshrl.u32 %v502_v41, 23  ;;  %v4196_v10 = vmov 683565275   ;;  %v207_v12 = vshll.u32 %v4194_v58, %v2714_v44 }
  0xda   :  { %v204_v11 = vshll.u32 %v4196_v10, %v2714_v44  ;;  %v2811_v18 = vsub.s32 32, %v2779_v46  ;;  %v2813_v21 = vand.u32 31, %v407_v51  ;;  %v2816_v26 = vadd.f32 %v173_v52, %v2692_v5 }
  0xdb   :  { %v2819_v29 = vadd.f32 %v173_v52, %v2694_v9  ;;  %v209_v39 = vor.u32 %v208_v30, %v207_v12  ;;  %v210_v33 = vshll.u32 %v4192_v20, %v2714_v44  ;;  %v211_v41 = vshrl.u32 %v4205_v4, %v2724_v53 }
  0xdc   :  { %4233 = vst [vmem:[#allocation19_spill] sm:$0xff] %v2816_v26  ;;  %v206_v32 = vor.u32 %v205_v59, %v204_v11  ;;  %v2827_v13 = vshll.u32 %v4205_v4, %v2768_v37  ;;  %v2831_v6 = vshll.u32 %v4198_v19, %v2768_v37  ;;  %v2835_v52 = vshll.u32 %v4205_v4, %v2779_v46 }
  0xdd   :  { %4234 = vst [vmem:[#allocation20_spill] sm:$0xff] %v2819_v29  ;;  %v2839_v59 = vshll.u32 %v4198_v19, %v2779_v46  ;;  %v2843_v44 = vshrl.u32 %v4198_v19, %v2804_v50  ;;  %v2847_v30 = vshrl.u32 %v4190_v34, %v2804_v50  ;;  %v2282_v11 = vadd.s32 4294967169, %v503_v2 }
  0xde   :  { %v212_v12 = vor.u32 %v211_v41, %v210_v33  ;;  %v2851_v8 = vshrl.u32 %v4198_v19, %v2811_v18  ;;  %v2853_v7 = vshrl.u32 %v407_v51, 5  ;;  %v203_v0 = vshrl.u32 %v4196_v10, %v2724_v53 }
  0xdf   :  { %vm219_vm7 = vcmp.lt.s32.totalorder %v2747_v17, 1  ;;  %v2859_v1 = vsub.s32 32, %v2813_v21  ;;  %vm221_vm8 = vcmp.lt.s32.totalorder %v2747_v17, 3  ;;  %vm220_vm9 = vcmp.lt.s32.totalorder %v2747_v17, 2 }
  0xe0   :  { %v224_v2 = vsel %vm222_vm5, %v212_v12, 2102212464  ;;  %v227_v33 = vsel %vm219_vm7, %v206_v32, %v209_v39  ;;  %v223_v41 = vsel %vm219_vm7, %v203_v0, %v206_v32  ;;  %v229_v51 = vsel %vm221_vm8, %v212_v12, %v228_v43 }
  0xe1   :  { %v225_v3 = vsel %vm221_vm8, %v209_v39, %v224_v2  ;;  %v2865_v54 = vadd.s32 1, %v2282_v11  ;;  %v230_v34 = vsel %vm220_vm9, %v227_v33, %v229_v51  ;;  %v231_v53 = vsel %vm219_vm7, %v209_v39, %v212_v12 }
  0xe2   :  { %v233_v20 = vsel %vm221_vm8, %v2756_v24, %v232_v48  ;;  %v421_v58 = vshll.u32 %v4205_v4, %v2813_v21  ;;  %v235_v14 = vshll.u32 %v195_v40, 8  ;;  %v422_v9 = vshrl.u32 %v4235_v16, %v2859_v1 }
  0xe3   :  { %v234_v19 = vsel %vm220_vm9, %v231_v53, %v233_v20  ;;  %v226_v17 = vsel %vm220_vm9, %v223_v41, %v225_v3  ;;  %v4236_v0 = vmov 683565275   ;;  %v4237_v32 = vmov 2475754826  }
  0xe4   :  { %v308_v43 = vshll.u32 %v4236_v0, %v2716_v45  ;;  %v309_v11 = vshrl.u32 %v4237_v32, %v2728_v55  ;;  %v2877_v39 = vmul.u32.u64.low %v235_v14, %v234_v19  ;;  %v2878_v12 = vmul.u32.u64.high %v235_v14, %v234_v19, %v2877_v39 }
  0xe5   :  { %v2880_v24 = vmul.u32.u64.low %v235_v14, %v230_v34  ;;  %v2881_v48 = vmul.u32.u64.high %v235_v14, %v230_v34, %v2880_v24  ;;  %v299_v20 = vor.u32 8388608, %v2773_v42  ;;  %v311_v2 = vshll.u32 %v4237_v32, %v2716_v45 }
  0xe6   :  { %v310_v40 = vor.u32 %v309_v11, %v308_v43  ;;  %v4238_v3 = vmov 2131351028   ;;  %v4239_v41 = vmov 1326507024   ;;  %v307_v19 = vshrl.u32 %v4236_v0, %v2728_v55 }
  0xe7   :  { %v312_v33 = vshrl.u32 %v4238_v3, %v2728_v55  ;;  %v425_v51 = vshrl.u32 %v4239_v41, %v2859_v1  ;;  %v314_v34 = vshll.u32 %v4238_v3, %v2716_v45  ;;  %v315_v53 = vshrl.u32 %v4205_v4, %v2728_v55 }
  0xe8   :  { %v242_v42 = vmul.u32 %v235_v14, %v226_v17  ;;  %vm323_vm10 = vcmp.lt.s32.totalorder %v2758_v25, 1  ;;  %vm324_vm11 = vcmp.lt.s32.totalorder %v2758_v25, 2  ;;  %vm244_vm12 = vc.u32 %v2878_v12, %v2880_v24 }
  0xe9   :  { %v313_v43 = vor.u32 %v312_v33, %v311_v2  ;;  %v245_v11 = vadd.s32 1, %v2881_v48  ;;  %v316_v39 = vor.u32 %v315_v53, %v314_v34  ;;  %vm325_vm13 = vcmp.lt.s32.totalorder %v2758_v25, 3 }
  0xea   :  { %v327_v10 = vsel %vm323_vm10, %v307_v19, %v310_v40  ;;  %v337_v45 = vsel %vm325_vm13, %v2762_v36, %v2795_v60  ;;  %v339_v55 = vshll.u32 %v299_v20, 8  ;;  %v424_v36 = vshll.u32 %v4235_v16, %v2813_v21 }
  0xeb   :  { %v331_v15 = vsel %vm323_vm10, %v310_v40, %v313_v43  ;;  %v246_v14 = vsel %vm244_vm12, %v245_v11, %v2881_v48  ;;  %v328_v17 = vsel %vm326_vm6, %v316_v39, 2102212464  ;;  %v333_v2 = vsel %vm325_vm13, %v316_v39, %v2789_v49 }
  0xec   :  { %v335_v33 = vsel %vm323_vm10, %v313_v43, %v316_v39  ;;  %v247_v4 = vadd.s32 %v246_v14, %v242_v42  ;;  %v329_v5 = vsel %vm325_vm13, %v313_v43, %v328_v17  ;;  %v334_v34 = vsel %vm324_vm11, %v331_v15, %v333_v2 }
  0xed   :  { %v338_v40 = vsel %vm324_vm11, %v335_v33, %v337_v45  ;;  %v4208_v48 = vand.u32 2147483647, %v2711_v31  ;;  %v423_v19 = vor.u32 %v422_v9, %v421_v58  ;;  %v426_v42 = vor.u32 %v425_v51, %v424_v36 }
  0xee   :  { %v2915_v60 = vmul.u32.u64.low %v339_v55, %v338_v40  ;;  %v2916_v20 = vmul.u32.u64.high %v339_v55, %v338_v40, %v2915_v60  ;;  %v248_v53 = vadd.s32 536870912, %v247_v4  ;;  %v330_v15 = vsel %vm324_vm11, %v327_v10, %v329_v5 }
  0xef   :  { %v2919_v49 = vmul.u32.u64.low %v339_v55, %v334_v34  ;;  %v2920_v11 = vmul.u32.u64.high %v339_v55, %v334_v34, %v2919_v49  ;;  %v412_v43 = vshll.u32 %v4236_v0, %v2813_v21  ;;  %v413_v39 = vshrl.u32 %v4237_v32, %v2859_v1 }
  0xf0   :  { %v2929_v45 = vshrl.u32 %v248_v53, 30  ;;  %v415_v9 = vshll.u32 %v4237_v32, %v2813_v21  ;;  %v416_v58 = vshrl.u32 %v4238_v3, %v2859_v1  ;;  %v4240_v14 = vmov 2102212464  }
  0xf1   :  { %v419_v51 = vshrl.u32 %v4240_v14, %v2859_v1  ;;  %vm430_vm14 = vcmp.lt.s32.totalorder %v2853_v7, 4  ;;  %vm348_vm15 = vc.u32 %v2916_v20, %v2919_v49  ;;  %v402_v5 = vand.u32 8388607, %v4208_v48 }
  0xf2   :  { %v418_v25 = vshll.u32 %v4238_v3, %v2813_v21  ;;  %v250_v10 = vshll.u32 %v2929_v45, 30  ;;  %v349_v17 = vadd.s32 1, %v2920_v11  ;;  %v414_v2 = vor.u32 %v413_v39, %v412_v43 }
  0xf3   :  { %v417_v33 = vor.u32 %v416_v58, %v415_v9  ;;  %v436_v34 = vsel %vm430_vm14, %v423_v19, 920167782  ;;  %vm510_vm0 = vcmp.gt.s32.totalorder %v2865_v54, 0  ;;  %v346_v40 = vmul.u32 %v339_v55, %v330_v15 }
  0xf4   :  { %v420_v36 = vor.u32 %v419_v51, %v418_v25  ;;  %v440_v60 = vsel %vm430_vm14, %v426_v42, 1326507024  ;;  %v4241_v53 = vand.u32 2139095040, %v2816_v26  ;;  %v2953_v21 = vsub.s32 %v247_v4, %v250_v10 }
  0xf5   :  { %v350_v47 = vsel %vm348_vm15, %v349_v17, %v2920_v11  ;;  %v403_v43 = vor.u32 8388608, %v402_v5  ;;  %vm427_vm1 = vcmp.lt.s32.totalorder %v2853_v7, 1  ;;  %vm429_vm2 = vcmp.lt.s32.totalorder %v2853_v7, 3 }
  0xf6   :  { %v607_v48 = vshrl.u32 %v4241_v53, 23  ;;  %v351_v31 = vadd.s32 %v350_v47, %v346_v40  ;;  %v945_v55 = vshrl.u32 %v4239_v41, %v2811_v18  ;;  %v710_v15 = vand.u32 2139095040, %v2819_v29 }
  0xf7   :  { %v435_v42 = vsel %vm427_vm1, %v414_v2, %v417_v33  ;;  %v437_v4 = vsel %vm429_vm2, %v420_v36, %v436_v34  ;;  %v2967_v11 = vor.u32 %v2843_v44, %v2827_v13  ;;  %v511_v47 = vsel %vm510_vm0, %v2865_v54, 0 }
  0xf8   :  { %v352_v39 = vadd.s32 536870912, %v351_v31  ;;  %v439_v9 = vsel %vm427_vm1, %v417_v33, %v420_v36  ;;  %v2286_v58 = vadd.s32 4294967169, %v607_v48  ;;  %v253_v51 = vsub.s32 0, %v2953_v21 }
  0xf9   :  { %vm428_vm3 = vcmp.lt.s32.totalorder %v2853_v7, 2  ;;  %v441_v5 = vsel %vm429_vm2, %v423_v19, %v440_v60  ;;  %v443_v44 = vshll.u32 %v403_v43, 8  ;;  %v842_v10 = vor.u32 %v2847_v30, %v2831_v6 }
  0xfa   :  { %v2978_v25 = vshrl.u32 %v352_v39, 30  ;;  %v438_v13 = vsel %vm428_vm3, %v435_v42, %v437_v4  ;;  %v442_v54 = vsel %vm428_vm3, %v439_v9, %v441_v5  ;;  %v513_v48 = vand.u32 31, %v511_v47 }
  0xfb   :  { %v711_v17 = vshrl.u32 %v710_v15, 23  ;;  %v432_v34 = vsel %vm430_vm14, %v420_v36, 2102212464  ;;  %v411_v19 = vshrl.u32 %v4236_v0, %v2859_v1  ;;  %v613_v42 = vadd.s32 1, %v2286_v58 }
  0xfc   :  { %v354_v40 = vshll.u32 %v2978_v25, 30  ;;  %v2991_v60 = vmul.u32.u64.low %v443_v44, %v442_v54  ;;  %v2992_v53 = vmul.u32.u64.high %v443_v44, %v442_v54, %v2991_v60  ;;  %v2271_v4 = vmin.u32 %v253_v51, %v2953_v21 }
  0xfd   :  { %v2995_v43 = vmul.u32.u64.low %v443_v44, %v438_v13  ;;  %v2996_v39 = vmul.u32.u64.high %v443_v44, %v438_v13, %v2995_v43  ;;  %v3001_v6 = vor.u32 %v2851_v8, %v2835_v52  ;;  %v431_v36 = vsel %vm427_vm1, %v411_v19, %v414_v2 }
  0xfe   :  { %v3003_v30 = vsub.s32 %v351_v31, %v354_v40  ;;  %v433_v1 = vsel %vm429_vm2, %v417_v33, %v432_v34  ;;  %vm846_vm4 = vcmp.lt.s32.totalorder %v2797_v38, 4  ;;  %v946_v15 = vor.u32 %v945_v55, %v2839_v59 }
  0xff   :  { %4242 = vst [vmem:[#allocation21_spill] sm:$0xff] %v3001_v6  ;;  %v3011_v9 = vsub.s32 32, %v513_v48  ;;  %v3015_v58 = vmul.f32 %v2764_v28, %v2732_v23  ;;  %v3020_v8 = vsel %vm846_vm4, %v2967_v11, 920167782  ;;  %v3024_v31 = vsel %vm846_vm4, %v842_v10, 1326507024 }
 0x100   :  { %vm950_vm5 = vcmp.lt.s32.totalorder %v2799_v61, 4  ;;  %v2290_v52 = vadd.s32 4294967169, %v711_v17  ;;  %vm614_vm6 = vcmp.gt.s32.totalorder %v613_v42, 0  ;;  %v255_v59 = vclz %v2271_v4 }
 0x101   :  { %4243 = vst [vmem:[#allocation22_spill] sm:$0xff] %v3015_v58  ;;  %v357_v2 = vsub.s32 0, %v3003_v30  ;;  %v434_v23 = vsel %vm428_vm3, %v431_v36, %v433_v1  ;;  %v3033_v28 = vsel %vm950_vm5, %v3001_v6, 920167782  ;;  %v3035_v33 = vshrl.u32 %v511_v47, 5 }
 0x102   :  { %4244 = vst [vmem:[#allocation23_spill] sm:$0xff] %v3033_v28  ;;  %vm452_vm7 = vc.u32 %v2992_v53, %v2995_v43  ;;  %v453_v55 = vadd.s32 1, %v2996_v39  ;;  %v3042_v51 = vsel %vm950_vm5, %v946_v15, 1326507024  ;;  %v525_v5 = vshll.u32 %v4240_v14, %v513_v48 }
 0x103   :  { %4245 = vst [vmem:[#allocation24_spill] sm:$0xff] %v3042_v51  ;;  %v526_v7 = vshrl.u32 %v4235_v16, %v3011_v9  ;;  %v529_v13 = vshrl.u32 %v4239_v41, %v3011_v9  ;;  %v528_v47 = vshll.u32 %v4235_v16, %v513_v48  ;;  %v615_v54 = vsel %vm614_vm6, %v613_v42, 0 }
 0x104   :  { %v717_v10 = vadd.s32 1, %v2290_v52  ;;  %v450_v17 = vmul.u32 %v443_v44, %v434_v23  ;;  %v2272_v34 = vadd.s32 4294967294, %v255_v59  ;;  %v2275_v40 = vmin.u32 %v357_v2, %v3003_v30  ;;  %v1021_v59 = vpop.permute.xlu1 %1020 }
 0x105   :  { %v454_v19 = vsel %vm452_vm7, %v453_v55, %v2996_v39  ;;  %v4215_v60 = vand.u32 2147483647, %v2754_v22  ;;  %vm534_vm8 = vcmp.lt.s32.totalorder %v3035_v33, 4  ;;  %v517_v36 = vshrl.u32 %v4237_v32, %v3011_v9 }
 0x106   :  { %v455_v4 = vadd.s32 %v454_v19, %v450_v17  ;;  %v520_v1 = vshrl.u32 %v4238_v3, %v3011_v9  ;;  %v527_v15 = vor.u32 %v526_v7, %v525_v5  ;;  %v530_v42 = vor.u32 %v529_v13, %v528_v47 }
 0x107   :  { %v3058_v52 = vand.u32 31, %v615_v54  ;;  %v523_v44 = vshrl.u32 %v4240_v14, %v3011_v9  ;;  %v516_v2 = vshll.u32 %v4236_v0, %v513_v48  ;;  %v519_v23 = vshll.u32 %v4237_v32, %v513_v48 }
 0x108   :  { %v456_v39 = vadd.s32 536870912, %v455_v4  ;;  %v522_v55 = vshll.u32 %v4238_v3, %v513_v48  ;;  %vm718_vm9 = vcmp.gt.s32.totalorder %v717_v10, 0  ;;  %vm2273_vm10 = vcmp.lt.s32.totalorder %v2272_v34, 0 }
 0x109   :  { %v359_v17 = vclz %v2275_v40  ;;  %v506_v5 = vand.u32 8388607, %v4215_v60  ;;  %v518_v13 = vor.u32 %v517_v36, %v516_v2  ;;  %v521_v47 = vor.u32 %v520_v1, %v519_v23 }
 0x10a   :  { %v3067_v7 = vshrl.u32 %v456_v39, 30  ;;  %v524_v19 = vor.u32 %v523_v44, %v522_v55  ;;  %v540_v58 = vsel %vm534_vm8, %v527_v15, 920167782  ;;  %v3071_v29 = vshrl.u32 %v615_v54, 5 }
 0x10b   :  { %v3074_v26 = vmul.f32 %v1021_v59, %v2679_v56  ;;  %v3077_v48 = vmul.f32 %v1021_v59, %v2681_v57  ;;  %v3080_v40 = vsub.s32 32, %v3058_v52  ;;  %v719_v60 = vsel %vm718_vm9, %v717_v10, 0 }
 0x10c   :  { %v3082_v39 = vsel %vm2273_vm10, 0, %v2272_v34  ;;  %v458_v36 = vshll.u32 %v3067_v7, 30  ;;  %v544_v1 = vsel %vm534_vm8, %v530_v42, 1326507024  ;;  %v507_v44 = vor.u32 8388608, %v506_v5 }
 0x10d   :  { %4246 = vst [vmem:[#allocation25_spill] sm:$0xff] %v3074_v26  ;;  %4247 = vst [vmem:[#allocation26_spill] sm:$0xff] %v3077_v48  ;;  %vm531_vm11 = vcmp.lt.s32.totalorder %v3035_v33, 1  ;;  %vm533_vm12 = vcmp.lt.s32.totalorder %v3035_v33, 3  ;;  %v2276_v56 = vadd.s32 4294967294, %v359_v17  ;;  %v629_v34 = vshll.u32 %v4240_v14, %v3058_v52 }
 0x10e   :  { %v3089_v54 = vsub.s32 %v455_v4, %v458_v36  ;;  %v539_v57 = vsel %vm531_vm11, %v518_v13, %v521_v47  ;;  %v541_v10 = vsel %vm533_vm12, %v524_v19, %v540_v58  ;;  %v3097_v59 = vand.u32 31, %v719_v60 }
 0x10f   :  { %v263_v42 = vsub.s32 4294967266, %v3082_v39  ;;  %v543_v2 = vsel %vm531_vm11, %v521_v47, %v524_v19  ;;  %v630_v4 = vshrl.u32 %v4235_v16, %v3080_v40  ;;  %v515_v55 = vshrl.u32 %v4236_v0, %v3011_v9 }
 0x110   :  { %v461_v23 = vsub.s32 0, %v3089_v54  ;;  %vm532_vm13 = vcmp.lt.s32.totalorder %v3035_v33, 2  ;;  %v536_v58 = vsel %vm534_vm8, %v524_v19, 2102212464  ;;  %v545_v5 = vsel %vm533_vm12, %v527_v15, %v544_v1 }
 0x111   :  { %v542_v17 = vsel %vm532_vm13, %v539_v57, %v541_v10  ;;  %v547_v36 = vshll.u32 %v507_v44, 8  ;;  %v633_v26 = vshrl.u32 %v4239_v41, %v3080_v40  ;;  %vm2277_vm14 = vcmp.lt.s32.totalorder %v2276_v56, 0 }
 0x112   :  { %v2279_v48 = vmin.u32 %v461_v23, %v3089_v54  ;;  %v546_v9 = vsel %vm532_vm13, %v543_v2, %v545_v5  ;;  %v264_v6 = vadd.s32 127, %v263_v42  ;;  %v535_v19 = vsel %vm531_vm11, %v515_v55, %v518_v13 }
 0x113   :  { %v3121_v51 = vmul.u32.u64.low %v547_v36, %v546_v9  ;;  %v3122_v28 = vmul.u32.u64.high %v547_v36, %v546_v9, %v3121_v51  ;;  %v537_v15 = vsel %vm533_vm12, %v521_v47, %v536_v58  ;;  %v632_v10 = vshll.u32 %v4235_v16, %v3058_v52 }
 0x114   :  { %v463_v57 = vclz %v2279_v48  ;;  %v3126_v1 = vmul.u32.u64.low %v547_v36, %v542_v17  ;;  %v3127_v44 = vmul.u32.u64.high %v547_v36, %v542_v17, %v3126_v1  ;;  %vm638_vm15 = vcmp.lt.s32.totalorder %v3071_v29, 4 }
 0x115   :  { %v3134_v42 = vsub.s32 32, %v3097_v59  ;;  %v3136_v13 = vsel %vm2277_vm14, 0, %v2276_v56  ;;  %v3138_v2 = vor.u32 %v630_v4, %v629_v34  ;;  %v3140_v51 = vshrl.u32 %v719_v60, 5 }
 0x116   :  { %v259_v47 = vsub.s32 32, %v3082_v39  ;;  %v2280_v48 = vadd.s32 4294967294, %v463_v57  ;;  %v634_v23 = vor.u32 %v633_v26, %v632_v10  ;;  %v243_v55 = vadd.s32 %v2880_v24, %v2878_v12 }
 0x117   :  { %4248 = vst [vmem:[#allocation27_spill] sm:$0xff] %v3134_v42  ;;  %v265_v58 = vshll.u32 %v264_v6, 23  ;;  %v538_v17 = vsel %vm532_vm13, %v535_v19, %v537_v15  ;;  %v367_v5 = vsub.s32 4294967266, %v3136_v13  ;;  %vm556_vm1 = vc.u32 %v3122_v28, %v3126_v1 }
 0x118   :  { %vm2281_vm0 = vcmp.lt.s32.totalorder %v2280_v48, 0  ;;  %v557_v60 = vadd.s32 1, %v3127_v44  ;;  %v733_v56 = vshll.u32 %v4240_v14, %v3097_v59  ;;  %v734_v26 = vshrl.u32 %v4235_v16, %v3134_v42 }
 0x119   :  { %v736_v12 = vshll.u32 %v4235_v16, %v3097_v59  ;;  %v737_v24 = vshrl.u32 %v4239_v41, %v3134_v42  ;;  %vm189_vm2 = vcmp.lt.s32.totalorder %v2685_v62, 0  ;;  %vm742_vm3 = vcmp.lt.s32.totalorder %v3140_v51, 4 }
 0x11a   :  { %v261_v6 = vshrl.u32 %v243_v55, %v259_v47  ;;  %v3161_v33 = vsel %vm2281_vm0, 0, %v2280_v48  ;;  %v554_v34 = vmul.u32 %v547_v36, %v538_v17  ;;  %v3166_v4 = vsel %vm638_vm15, %v3138_v2, 920167782 }
 0x11b   :  { %v3170_v9 = vsel %vm638_vm15, %v634_v23, 1326507024  ;;  %v266_v19 = vor.u32 4788187, %v265_v58  ;;  %v558_v57 = vsel %vm556_vm1, %v557_v60, %v3127_v44  ;;  %v260_v15 = vshll.u32 %v2953_v21, %v3082_v39 }
 0x11c   :  { %v363_v10 = vsub.s32 32, %v3136_v13  ;;  %v368_v47 = vadd.s32 127, %v367_v5  ;;  %v559_v48 = vadd.s32 %v558_v57, %v554_v34  ;;  %v3176_v36 = vor.u32 %v734_v26, %v733_v56 }
 0x11d   :  { %v738_v55 = vor.u32 %v737_v24, %v736_v12  ;;  %v471_v17 = vsub.s32 4294967266, %v3161_v33  ;;  %v4219_v41 = vand.u32 2147483647, %v2704_v27  ;;  %v262_v16 = vor.u32 %v261_v6, %v260_v15 }
 0x11e   :  { %4249 = vst [vmem:[#allocation28_spill] sm:$0xff] %v3176_v36  ;;  %v273_v23 = vsub.s32 4, %v2929_v45  ;;  %v347_v44 = vadd.s32 %v2919_v49, %v2916_v20  ;;  %v560_v58 = vadd.s32 536870912, %v559_v48  ;;  %v4250_v21 = vand.u32 2147483647, %v2685_v62 }
 0x11f   :  { %v267_v5 = vand.u32 2147483647, %v266_v19  ;;  %v829_v60 = vshrl.u32 %v4237_v32, %v2804_v50  ;;  %v832_v56 = vshrl.u32 %v4238_v3, %v2804_v50  ;;  %v835_v26 = vshrl.u32 %v4240_v14, %v2804_v50 }
 0x120   :  { %vm3185_vm6 = vcmp.le.f32.partialorder %v4250_v21, 0.7853982  ;;  %v365_v12 = vshrl.u32 %v347_v44, %v363_v10  ;;  %v369_v24 = vshll.u32 %v368_v47, 23  ;;  %v3195_v20 = vshrl.u32 %v560_v58, 30 }
 0x121   :  { %v834_v49 = vshll.u32 %v4238_v3, %v2768_v37  ;;  %v472_v6 = vadd.s32 127, %v471_v17  ;;  %v818_v34 = vand.u32 8388607, %v4219_v41  ;;  %v828_v19 = vshll.u32 %v4236_v0, %v2768_v37 }
 0x122   :  { %v831_v57 = vshll.u32 %v4237_v32, %v2768_v37  ;;  %v269_v15 = vcvt.s32.f32 %v262_v16  ;;  %v364_v10 = vshll.u32 %v3003_v30, %v3136_v13  ;;  %v562_v47 = vshll.u32 %v3195_v20, 30 }
 0x123   :  { %v836_v44 = vor.u32 %v835_v26, %v834_v49  ;;  %v3210_v58 = vsel %vm742_vm3, %v738_v55, 1326507024  ;;  %v274_v17 = vsel %vm189_vm2, %v273_v23, %v2929_v45  ;;  %v830_v21 = vor.u32 %v829_v60, %v828_v19 }
 0x124   :  { %v833_v41 = vor.u32 %v832_v56, %v831_v57  ;;  %v270_v27 = vmul.f32 %v269_v15, %v267_v5  ;;  %v366_v36 = vor.u32 %v365_v12, %v364_v10  ;;  %v370_v37 = vor.u32 4788187, %v369_v24 }
 0x125   :  { %v3215_v16 = vsub.s32 %v559_v48, %v562_v47  ;;  %v467_v30 = vsub.s32 32, %v3161_v33  ;;  %v473_v13 = vshll.u32 %v472_v6, 23  ;;  %v819_v42 = vor.u32 8388608, %v818_v34 }
 0x126   :  { %v827_v26 = vshrl.u32 %v4236_v0, %v2804_v50  ;;  %vm843_vm7 = vcmp.lt.s32.totalorder %v2797_v38, 1  ;;  %vm845_vm8 = vcmp.lt.s32.totalorder %v2797_v38, 3  ;;  %v848_v45 = vsel %vm846_vm4, %v836_v44, 2102212464 }
 0x127   :  { %v565_v55 = vsub.s32 0, %v3215_v16  ;;  %v851_v23 = vsel %vm843_vm7, %v830_v21, %v833_v41  ;;  %v853_v48 = vsel %vm845_vm8, %v836_v44, %v3020_v8  ;;  %v855_v5 = vsel %vm843_vm7, %v833_v41, %v836_v44 }
 0x128   :  { %v857_v60 = vsel %vm845_vm8, %v2967_v11, %v3024_v31  ;;  %v276_v56 = vsel %vm3185_vm6, 0, %v274_v17  ;;  %v451_v50 = vadd.s32 %v2995_v43, %v2992_v53  ;;  %vm844_vm9 = vcmp.lt.s32.totalorder %v2797_v38, 2 }
 0x129   :  { %v2283_v12 = vmin.u32 %v565_v55, %v3215_v16  ;;  %v271_v24 = vxor.u32 2147483648, %v270_v27  ;;  %v371_v49 = vand.u32 2147483647, %v370_v37  ;;  %v847_v6 = vsel %vm843_vm7, %v827_v26, %v830_v21 }
 0x12a   :  { %v858_v8 = vsel %vm844_vm9, %v855_v5, %v857_v60  ;;  %v849_v19 = vsel %vm845_vm8, %v833_v41, %v848_v45  ;;  %v854_v11 = vsel %vm844_vm9, %v851_v23, %v853_v48  ;;  %v859_v31 = vshll.u32 %v819_v42, 8 }
 0x12b   :  { %v567_v34 = vclz %v2283_v12  ;;  %v3238_v57 = vadd.s32 3, %v276_v56  ;;  %v373_v15 = vcvt.s32.f32 %v366_v36  ;;  %v469_v53 = vshrl.u32 %v451_v50, %v467_v30 }
 0x12c   :  { %v474_v43 = vor.u32 4788187, %v473_v13  ;;  %v468_v10 = vshll.u32 %v3089_v54, %v3161_v33  ;;  %v3242_v44 = vmul.u32.u64.low %v859_v31, %v858_v8  ;;  %v3243_v17 = vmul.u32.u64.high %v859_v31, %v858_v8, %v3242_v44 }
 0x12d   :  { %v2284_v47 = vadd.s32 4294967294, %v567_v34  ;;  %vm293_vm4 = vcmp.lt.s32.totalorder %v2688_v63, 0  ;;  %v850_v41 = vsel %vm844_vm9, %v847_v6, %v849_v19  ;;  %v915_v42 = vand.u32 2147483647, %v2707_v35 }
 0x12e   :  { %v3248_v21 = vmul.u32.u64.low %v859_v31, %v854_v11  ;;  %v3249_v37 = vmul.u32.u64.high %v859_v31, %v854_v11, %v3248_v21  ;;  %v272_v36 = vsel %vm189_vm2, %v271_v24, %v270_v27  ;;  %v374_v30 = vmul.f32 %v373_v15, %v371_v49  ;;  %v4253_v11 = vld [vmem:[#allocation17_spill] sm:$0xff] }
 0x12f   :  { %v377_v54 = vsub.s32 4, %v2978_v25  ;;  %vm2285_vm10 = vcmp.lt.s32.totalorder %v2284_v47, 0  ;;  %v470_v33 = vor.u32 %v469_v53, %v468_v10  ;;  %v475_v13 = vand.u32 2147483647, %v474_v43 }
 0x130   :  { %v555_v26 = vadd.s32 %v3126_v1, %v3122_v28  ;;  %v570_v38 = vsel %vm2285_vm10, 0, %v2284_v47  ;;  %v866_v23 = vmul.u32 %v859_v31, %v850_v41  ;;  %v932_v48 = vshll.u32 %v4236_v0, %v2779_v46 }
 0x131   :  { %v571_v55 = vsub.s32 32, %v570_v38  ;;  %v575_v45 = vsub.s32 4294967266, %v570_v38  ;;  %vm868_vm11 = vc.u32 %v3243_v17, %v3248_v21  ;;  %v869_v27 = vadd.s32 1, %v3249_v37 }
 0x132   :  { %v922_v5 = vand.u32 8388607, %v915_v42  ;;  %v933_v60 = vshrl.u32 %v4237_v32, %v2811_v18  ;;  %v572_v28 = vshll.u32 %v3215_v16, %v570_v38  ;;  %v936_v50 = vshrl.u32 %v4238_v3, %v2811_v18 }
 0x133   :  { %v573_v1 = vshrl.u32 %v555_v26, %v571_v55  ;;  %v576_v56 = vadd.s32 127, %v575_v45  ;;  %v870_v12 = vsel %vm868_vm11, %v869_v27, %v3249_v37  ;;  %v935_v24 = vshll.u32 %v4237_v32, %v2779_v46 }
 0x134   :  { %v938_v49 = vshll.u32 %v4238_v3, %v2779_v46  ;;  %v939_v6 = vshrl.u32 %v4240_v14, %v2811_v18  ;;  %v477_v8 = vcvt.s32.f32 %v470_v33  ;;  %v871_v16 = vadd.s32 %v870_v12, %v866_v23  ;;  %v4260_v23 = vld [vmem:[#allocation23_spill] sm:$0xff] }
 0x135   :  { %v574_v34 = vor.u32 %v573_v1, %v572_v28  ;;  %v577_v19 = vshll.u32 %v576_v56, 23  ;;  %vm397_vm12 = vcmp.lt.s32.totalorder %v4253_v11, 0  ;;  %v4254_v31 = vand.u32 2147483647, %v2688_v63  ;;  %v4261_v56 = vld [vmem:[#allocation24_spill] sm:$0xff] }
 0x136   :  { %v375_v53 = vxor.u32 2147483648, %v374_v30  ;;  %v934_v43 = vor.u32 %v933_v60, %v932_v48  ;;  %v937_v10 = vor.u32 %v936_v50, %v935_v24  ;;  %v940_v47 = vor.u32 %v939_v6, %v938_v49  ;;  %v4262_v50 = vld [vmem:[#allocation21_spill] sm:$0xff] }
 0x137   :  { %vm3280_vm13 = vcmp.le.f32.partialorder %v4254_v31, 0.7853982  ;;  %v378_v46 = vsel %vm293_vm4, %v377_v54, %v2978_v25  ;;  %v478_v44 = vmul.f32 %v477_v8, %v475_v13  ;;  %v578_v41 = vor.u32 4788187, %v577_v19 }
 0x138   :  { %v872_v37 = vadd.s32 536870912, %v871_v16  ;;  %v275_v33 = vsel %vm3185_vm6, %v2685_v62, %v272_v36  ;;  %v481_v26 = vsub.s32 4, %v3067_v7  ;;  %v923_v38 = vor.u32 8388608, %v922_v5 }
 0x139   :  { %vm947_vm14 = vcmp.lt.s32.totalorder %v2799_v61, 1  ;;  %vm501_vm0 = vcmp.lt.s32.totalorder %v2754_v22, 0  ;;  %v4257_v55 = vand.u32 2147483647, %v4253_v11  ;;  %v579_v25 = vand.u32 2147483647, %v578_v41 }
 0x13a   :  { %v581_v54 = vcvt.s32.f32 %v574_v34  ;;  %v3299_v13 = vshrl.u32 %v872_v37, 30  ;;  %vm949_vm2 = vcmp.lt.s32.totalorder %v2799_v61, 3  ;;  %v376_v39 = vsel %vm293_vm4, %v375_v53, %v374_v30 }
 0x13b   :  { %vm3295_vm1 = vcmp.le.f32.partialorder %v4257_v55, 0.7853982  ;;  %v955_v36 = vsel %vm947_vm14, %v934_v43, %v937_v10  ;;  %v957_v48 = vsel %vm949_vm2, %v940_v47, %v4260_v23  ;;  %v959_v27 = vsel %vm947_vm14, %v937_v10, %v940_v47 }
 0x13c   :  { %v479_v5 = vxor.u32 2147483648, %v478_v44  ;;  %v582_v60 = vmul.f32 %v581_v54, %v579_v25  ;;  %v931_v28 = vshrl.u32 %v4236_v0, %v2811_v18  ;;  %v952_v1 = vsel %vm950_vm5, %v940_v47, 2102212464 }
 0x13d   :  { %v874_v30 = vshll.u32 %v3299_v13, 30  ;;  %vm948_vm6 = vcmp.lt.s32.totalorder %v2799_v61, 2  ;;  %v961_v12 = vsel %vm949_vm2, %v4262_v50, %v4261_v56  ;;  %v963_v24 = vshll.u32 %v923_v38, 8 }
 0x13e   :  { %2446 = vcosq.f32 %v275_v33  ;;  %v951_v49 = vsel %vm947_vm14, %v931_v28, %v934_v43  ;;  %v958_v18 = vsel %vm948_vm6, %v955_v36, %v957_v48  ;;  %v962_v6 = vsel %vm948_vm6, %v959_v27, %v961_v12 }
 0x13f   :  { %v583_v8 = vxor.u32 2147483648, %v582_v60  ;;  %v953_v34 = vsel %vm949_vm2, %v937_v10, %v952_v1  ;;  %v3329_v19 = vmul.u32.u64.low %v963_v24, %v962_v6  ;;  %v3330_v31 = vmul.u32.u64.high %v963_v24, %v962_v6, %v3329_v19 }
 0x140   :  { %2448 = vsinq.f32 %v275_v33  ;;  %v379_v53 = vsel %vm3280_vm13, %v2688_v63, %v376_v39  ;;  %v380_v43 = vsel %vm3280_vm13, 0, %v378_v46  ;;  %v482_v47 = vsel %vm397_vm12, %v481_v26, %v3067_v7  ;;  %v4266_v46 = vld [vmem:[#allocation19_spill] sm:$0xff] }
 0x141   :  { %v480_v41 = vsel %vm397_vm12, %v479_v5, %v478_v44  ;;  %v3342_v37 = vsub.s32 %v871_v16, %v874_v30  ;;  %v3344_v10 = vmul.u32.u64.low %v963_v24, %v958_v18  ;;  %v3345_v38 = vmul.u32.u64.high %v963_v24, %v958_v18, %v3344_v10 }
 0x142   :  { %v3349_v33 = vand.u32 3, %v3238_v57  ;;  %v4263_v55 = vand.u32 2147483647, %v2754_v22  ;;  %v954_v7 = vsel %vm948_vm6, %v951_v49, %v953_v34  ;;  %v603_v44 = vand.u32 2147483647, %v4266_v46 }
 0x143   :  { %2450 = vcosq.f32 %v379_v53  ;;  %v384_v16 = vadd.s32 3, %v380_v43  ;;  %v484_v26 = vsel %vm3295_vm1, 0, %v482_v47  ;;  %v584_v57 = vsel %vm501_vm0, %v583_v8, %v582_v60 }
 0x144   :  { %vm3353_vm5 = vcmp.le.f32.partialorder %v4263_v55, 0.7853982  ;;  %2452 = vsinq.f32 %v379_v53  ;;  %v483_v25 = vsel %vm3295_vm1, %v4253_v11, %v480_v41  ;;  %v585_v54 = vsub.s32 4, %v3195_v20 }
 0x145   :  { %vm972_vm7 = vc.u32 %v3330_v31, %v3344_v10  ;;  %v877_v61 = vsub.s32 0, %v3342_v37  ;;  %v970_v39 = vmul.u32 %v963_v24, %v954_v7  ;;  %v973_v36 = vadd.s32 1, %v3345_v38 }
 0x146   :  { %v621_v23 = vshrl.u32 %v4237_v32, %v3080_v40  ;;  %v587_v48 = vsel %vm3353_vm5, %v2754_v22, %v584_v57  ;;  %v610_v45 = vand.u32 8388607, %v603_v44  ;;  %v623_v27 = vshll.u32 %v4237_v32, %v3058_v52 }
 0x147   :  { %v624_v5 = vshrl.u32 %v4238_v3, %v3080_v40  ;;  %v974_v60 = vsel %vm972_vm7, %v973_v36, %v3345_v38  ;;  %v620_v28 = vshll.u32 %v4236_v0, %v3058_v52  ;;  %v626_v1 = vshll.u32 %v4238_v3, %v3058_v52 }
 0x148   :  { %v627_v30 = vshrl.u32 %v4240_v14, %v3080_v40  ;;  %v2447_v56 = vpop.eup %2446  ;;  %vm283_vm8 = vcmp.eq.s32.totalorder %v3349_v33, 0  ;;  %vm286_vm9 = vcmp.eq.s32.totalorder %v3349_v33, 2  ;;  %2454 = vcosq.f32 %v483_v25 }
 0x149   :  { %v975_v50 = vadd.s32 %v974_v60, %v970_v39  ;;  %v625_v12 = vor.u32 %v624_v5, %v623_v27  ;;  %v3392_v24 = vand.u32 3, %v384_v16  ;;  %2456 = vsinq.f32 %v483_v25 }
 0x14a   :  { %v622_v49 = vor.u32 %v621_v23, %v620_v28  ;;  %v628_v18 = vor.u32 %v627_v30, %v626_v1  ;;  %v2449_v6 = vpop.eup %2448  ;;  %v488_v8 = vadd.s32 3, %v484_v26  ;;  %v586_v52 = vsel %vm501_vm0, %v585_v54, %v3195_v20 }
 0x14b   :  { %2458 = vcosq.f32 %v587_v48  ;;  %v976_v34 = vadd.s32 536870912, %v975_v50  ;;  %v2295_v19 = vmin.u32 %v877_v61, %v3342_v37  ;;  %v611_v53 = vor.u32 8388608, %v610_v45 }
 0x14c   :  { %2460 = vsinq.f32 %v587_v48  ;;  %vm635_vm4 = vcmp.lt.s32.totalorder %v3071_v29, 1  ;;  %v287_v43 = vxor.u32 2147483648, %v2447_v56  ;;  %vm637_vm10 = vcmp.lt.s32.totalorder %v3071_v29, 3 }
 0x14d   :  { %v3399_v47 = vshrl.u32 %v976_v34, 30  ;;  %v647_v41 = vsel %vm635_vm4, %v625_v12, %v628_v18  ;;  %v2451_v38 = vpop.eup %2450  ;;  %v284_v55 = vxor.u32 2147483648, %v2449_v6  ;;  %v643_v20 = vsel %vm635_vm4, %v622_v49, %v625_v12 }
 0x14e   :  { %v645_v7 = vsel %vm637_vm10, %v628_v18, %v3166_v4  ;;  %v649_v16 = vsel %vm637_vm10, %v3138_v2, %v3170_v9  ;;  %v2453_v26 = vpop.eup %2452  ;;  %vm279_vm11 = vweird.f32 %v2685_v62  ;;  %v3414_v57 = vand.u32 3, %v488_v8 }
 0x14f   :  { %v588_v25 = vsel %vm3353_vm5, 0, %v586_v52  ;;  %v978_v54 = vshll.u32 %v3399_v47, 30  ;;  %vm636_vm12 = vcmp.lt.s32.totalorder %v3071_v29, 2  ;;  %v879_v61 = vclz %v2295_v19 }
 0x150   :  { %v640_v4 = vsel %vm638_vm15, %v628_v18, 2102212464  ;;  %v650_v39 = vsel %vm636_vm12, %v647_v41, %v649_v16  ;;  %v651_v2 = vshll.u32 %v611_v53, 8  ;;  %v288_v9 = vsel %vm286_vm9, %v287_v43, %v2449_v6 }
 0x151   :  { %v3426_v36 = vsub.s32 %v975_v50, %v978_v54  ;;  %v619_v15 = vshrl.u32 %v4236_v0, %v3080_v40  ;;  %v646_v23 = vsel %vm636_vm12, %v643_v20, %v645_v7  ;;  %v285_v48 = vsel %vm283_vm8, %v2447_v56, %v284_v55  ;;  %v4267_v54 = vld [vmem:[#allocation20_spill] sm:$0xff] }
 0x152   :  { %v592_v45 = vadd.s32 3, %v588_v25  ;;  %v3434_v27 = vmul.u32.u64.low %v651_v2, %v650_v39  ;;  %v3435_v5 = vmul.u32.u64.high %v651_v2, %v650_v39, %v3434_v27  ;;  %v2455_v60 = vpop.eup %2454  ;;  %vm282_vm15 = vcmp.lt.s32.totalorder %v3349_v33, 2 }
 0x153   :  { %v981_v28 = vsub.s32 0, %v3426_v36  ;;  %v639_v1 = vsel %vm635_vm4, %v619_v15, %v622_v49  ;;  %v641_v40 = vsel %vm637_vm10, %v625_v12, %v640_v4  ;;  %v2457_v30 = vpop.eup %2456  ;;  %vm387_vm13 = vcmp.eq.s32.totalorder %v3392_v24, 0 }
 0x154   :  { %v2296_v50 = vadd.s32 4294967294, %v879_v61  ;;  %v3444_v56 = vmul.u32.u64.low %v651_v2, %v646_v23  ;;  %v3445_v18 = vmul.u32.u64.high %v651_v2, %v646_v23, %v3444_v56  ;;  %v289_v8 = vsel %vm282_vm15, %v285_v48, %v288_v9  ;;  %v4268_v23 = vld [vmem:[#allocation27_spill] sm:$0xff] }
 0x155   :  { %v2459_v6 = vpop.eup %2458  ;;  %vm390_vm14 = vcmp.eq.s32.totalorder %v3392_v24, 2  ;;  %vm491_vm0 = vcmp.eq.s32.totalorder %v3414_v57, 0  ;;  %v2299_v33 = vmin.u32 %v981_v28, %v3426_v36  ;;  %vm386_vm1 = vcmp.lt.s32.totalorder %v3392_v24, 2 }
 0x156   :  { %v2461_v49 = vpop.eup %2460  ;;  %v388_v12 = vxor.u32 2147483648, %v2453_v26  ;;  %v391_v52 = vxor.u32 2147483648, %v2451_v38  ;;  %vm490_vm2 = vcmp.lt.s32.totalorder %v3414_v57, 2  ;;  %v593_v34 = vand.u32 3, %v592_v45 }
 0x157   :  { %v642_v19 = vsel %vm636_vm12, %v639_v1, %v641_v40  ;;  %v492_v53 = vxor.u32 2147483648, %v2457_v30  ;;  %vm494_vm6 = vcmp.eq.s32.totalorder %v3414_v57, 2  ;;  %v495_v43 = vxor.u32 2147483648, %v2455_v60 }
 0x158   :  { %vm660_vm5 = vc.u32 %v3435_v5, %v3444_v56  ;;  %v290_v41 = vsel %vm279_vm11, nan, %v289_v8  ;;  %v599_v55 = vxor.u32 2147483648, %v2459_v6  ;;  %vm2297_vm7 = vcmp.lt.s32.totalorder %v2296_v50, 0 }
 0x159   :  { %v661_v20 = vadd.s32 1, %v3445_v18  ;;  %v596_v7 = vxor.u32 2147483648, %v2461_v49  ;;  %v983_v16 = vclz %v2299_v33  ;;  %v658_v25 = vmul.u32 %v651_v2, %v642_v19 }
 0x15a   :  { %v707_v29 = vand.u32 2147483647, %v4267_v54  ;;  %v389_v61 = vsel %vm387_vm13, %v2451_v38, %v388_v12  ;;  %v392_v4 = vsel %vm390_vm14, %v391_v52, %v2453_v26  ;;  %vm591_vm8 = vweird.f32 %v2754_v22 }
 0x15b   :  { %vm595_vm9 = vcmp.eq.s32.totalorder %v593_v34, 0  ;;  %v662_v62 = vsel %vm660_vm5, %v661_v20, %v3445_v18  ;;  %vm383_vm4 = vweird.f32 %v2688_v63  ;;  %v493_v39 = vsel %vm491_vm0, %v2455_v60, %v492_v53  ;;  %v1050_v18 = vpop.permute.xlu1 %1049 }
 0x15c   :  { %v496_v2 = vsel %vm494_vm6, %v495_v43, %v2457_v30  ;;  %vm598_vm10 = vcmp.eq.s32.totalorder %v593_v34, 2  ;;  %v663_v9 = vadd.s32 %v662_v62, %v658_v25  ;;  %v3474_v38 = vsel %vm2297_vm7, 0, %v2296_v50  ;;  %v4269_v43 = vld [vmem:[#allocation28_spill] sm:$0xff] }
 0x15d   :  { %v600_v15 = vsel %vm598_vm10, %v599_v55, %v2461_v49  ;;  %v727_v26 = vshll.u32 %v4237_v32, %v3097_v59  ;;  %v728_v48 = vshrl.u32 %v4238_v3, %v4268_v23  ;;  %v597_v45 = vsel %vm595_vm9, %v2459_v6, %v596_v7 }
 0x15e   :  { %v2300_v27 = vadd.s32 4294967294, %v983_v16  ;;  %v664_v28 = vadd.s32 536870912, %v663_v9  ;;  %v714_v60 = vand.u32 8388607, %v707_v29  ;;  %v725_v1 = vshrl.u32 %v4237_v32, %v4268_v23 }
 0x15f   :  { %v729_v40 = vor.u32 %v728_v48, %v727_v26  ;;  %v730_v30 = vshll.u32 %v4238_v3, %v3097_v59  ;;  %v731_v50 = vshrl.u32 %v4240_v14, %v4268_v23  ;;  %v393_v8 = vsel %vm386_vm1, %v389_v61, %v392_v4  ;;  %v1055_v4 = vpop.permute.xlu1 %1054 }
 0x160   :  { %v497_v6 = vsel %vm490_vm2, %v493_v39, %v496_v2  ;;  %vm594_vm11 = vcmp.lt.s32.totalorder %v593_v34, 2  ;;  %v3492_v33 = vshrl.u32 %v664_v28, 30  ;;  %v887_v12 = vsub.s32 4294967266, %v3474_v38 }
 0x161   :  { %v601_v49 = vsel %vm594_vm11, %v597_v45, %v600_v15  ;;  %v724_v52 = vshll.u32 %v4236_v0, %v3097_v59  ;;  %v732_v19 = vor.u32 %v731_v50, %v730_v30  ;;  %vm2301_vm12 = vcmp.lt.s32.totalorder %v2300_v27, 0 }
 0x162   :  { %v666_v53 = vshll.u32 %v3492_v33, 30  ;;  %vm739_vm15 = vcmp.lt.s32.totalorder %v3140_v51, 1  ;;  %vm741_vm13 = vcmp.lt.s32.totalorder %v3140_v51, 3  ;;  %v715_v24 = vor.u32 8388608, %v714_v60 }
 0x163   :  { %v726_v57 = vor.u32 %v725_v1, %v724_v52  ;;  %v751_v34 = vsel %vm739_vm15, %v729_v40, %v732_v19  ;;  %v753_v55 = vsel %vm741_vm13, %v4269_v43, %v3210_v58  ;;  %v748_v59 = vsel %vm742_vm3, %v4269_v43, 920167782 }
 0x164   :  { %vm487_vm14 = vweird.f32 %v4253_v11  ;;  %v602_v20 = vsel %vm591_vm8, nan, %v601_v49  ;;  %v3512_v7 = vsub.s32 %v663_v9, %v666_v53  ;;  %v394_v16 = vsel %vm383_vm4, nan, %v393_v8 }
 0x165   :  { %v1067_v25 = vmul.f32 %v1050_v18, %v290_v41  ;;  %v498_v61 = vsel %vm487_vm14, nan, %v497_v6  ;;  %vm740_vm0 = vcmp.lt.s32.totalorder %v3140_v51, 2  ;;  %v888_v58 = vadd.s32 127, %v887_v12  ;;  %v4270_v12 = vld [vmem:[#allocation22_spill] sm:$0xff] }
 0x166   :  { %v3518_v62 = vsel %vm2301_vm12, 0, %v2300_v27  ;;  %v669_v39 = vsub.s32 0, %v3512_v7  ;;  %v754_v22 = vsel %vm740_vm0, %v751_v34, %v753_v55  ;;  %v1070_v11 = vmul.f32 %v1055_v4, %v602_v20  ;;  %v4273_v20 = vld [vmem:[#allocation25_spill] sm:$0xff] }
 0x167   :  { %v747_v2 = vsel %vm739_vm15, %v726_v57, %v729_v40  ;;  %v749_v63 = vsel %vm741_vm13, %v732_v19, %v748_v59  ;;  %v755_v41 = vshll.u32 %v715_v24, 8  ;;  %v1068_v9 = vmul.f32 %v1050_v18, %v394_v16  ;;  %v4271_v24 = vld [vmem:[#allocation26_spill] sm:$0xff] }
 0x168   :  { %v1069_v15 = vmul.f32 %v1055_v4, %v498_v61  ;;  %v883_v26 = vsub.s32 32, %v3474_v38  ;;  %v2287_v48 = vmin.u32 %v669_v39, %v3512_v7  ;;  %v991_v45 = vsub.s32 4294967266, %v3518_v62  ;;  %v3564_v39 = vld [vmem:[#allocation5 + $0x40] sm:$0xff] }
 0x169   :  { %v744_v27 = vsel %vm742_vm3, %v732_v19, 2102212464  ;;  %v3532_v28 = vmul.u32.u64.low %v755_v41, %v754_v22  ;;  %v3533_v60 = vmul.u32.u64.high %v755_v41, %v754_v22, %v3532_v28  ;;  %v889_v1 = vshll.u32 %v888_v58, 23  ;;  %v3566_v22 = vld [vmem:[#allocation5 + $0x48] sm:$0xff] }
 0x16a   :  { %v671_v30 = vclz %v2287_v48  ;;  %v723_v50 = vshrl.u32 %v4236_v0, %v4268_v23  ;;  %v750_v18 = vsel %vm740_vm0, %v747_v2, %v749_v63  ;;  %v867_v8 = vadd.s32 %v3248_v21, %v3243_v17 }
 0x16b   :  { %v884_v6 = vshll.u32 %v3342_v37, %v3474_v38  ;;  %v971_v49 = vadd.s32 %v3344_v10, %v3330_v31  ;;  %v1078_v52 = vadd.f32 %v1070_v11, %v4270_v12  ;;  %v745_v23 = vsel %vm741_vm13, %v729_v40, %v744_v27  ;;  %v4272_v10 = vld [vmem:[#allocation18_spill] sm:$0xff] }
 0x16c   :  { %v2288_v19 = vadd.s32 4294967294, %v671_v30  ;;  %v743_v53 = vsel %vm739_vm15, %v723_v50, %v726_v57  ;;  %v1076_v34 = vadd.f32 %v1068_v9, %v4271_v24  ;;  %v885_v43 = vshrl.u32 %v867_v8, %v883_v26  ;;  %v3573_v50 = vld [vmem:[#allocation5 + $0x30] sm:$0xff] }
 0x16d   :  { %v992_v55 = vadd.s32 127, %v991_v45  ;;  %v3551_v17 = vmul.u32.u64.low %v755_v41, %v750_v18  ;;  %v3552_v21 = vmul.u32.u64.high %v755_v41, %v750_v18, %v3551_v17  ;;  %v890_v37 = vor.u32 4788187, %v889_v1 }
 0x16e   :  { %vm2289_vm3 = vcmp.lt.s32.totalorder %v2288_v19, 0  ;;  %v1622_v31 = vpack.c.bf16 %v1078_v52, %v1076_v34  ;;  %v1077_v38 = vadd.f32 %v1069_v15, %v4272_v10  ;;  %v659_v59 = vadd.s32 %v3444_v56, %v3435_v5  ;;  %v4274_v10 = vld [vmem:[#allocation16_spill] sm:$0xff] }
 0x16f   :  { %v674_v57 = vsel %vm2289_vm3, 0, %v2288_v19  ;;  %v746_v40 = vsel %vm740_vm0, %v743_v53, %v745_v23  ;;  %v1075_v16 = vadd.f32 %v1067_v25, %v4273_v20  ;;  %v987_v61 = vsub.s32 32, %v3518_v62 }
 0x170   :  { %v675_v4 = vsub.s32 32, %v674_v57  ;;  %v679_v58 = vsub.s32 4294967266, %v674_v57  ;;  %vm764_vm1 = vc.u32 %v3533_v60, %v3551_v17  ;;  %1662 = vmatprep.subr.bf16.mxu1 %v1622_v31  ;;  %1850 = vmatprep.subr.bf16.mxu0 %v1622_v31  ;;  %v886_v5 = vor.u32 %v885_v43, %v884_v6  ;;  %v3577_v6 = vld [vmem:[#allocation5 + $0x38] sm:$0xff] }
 0x171   :  { %v993_v56 = vshll.u32 %v992_v55, 23  ;;  %v765_v51 = vadd.s32 1, %v3552_v21  ;;  %v1621_v11 = vpack.c.bf16 %v1077_v38, %v1075_v16  ;;  %v676_v25 = vshll.u32 %v3512_v7, %v674_v57 }
 0x172   :  { %v677_v2 = vshrl.u32 %v659_v59, %v675_v4  ;;  %v680_v63 = vadd.s32 127, %v679_v58  ;;  %v762_v9 = vmul.u32 %v755_v41, %v746_v40  ;;  %v891_v15 = vand.u32 2147483647, %v890_v37 }
 0x173   :  { %v766_v26 = vsel %vm764_vm1, %v765_v51, %v3552_v21  ;;  %1663 = vmatpush1.bf16.msra.mxu1 %v1621_v11  ;;  %1851 = vmatpush1.bf16.msra.mxu0 %v1621_v11  ;;  %v1620_v48 = vpack.c.bf16 %v3566_v22, %v3564_v39  ;;  %v989_v45 = vshrl.u32 %v971_v49, %v987_v61  ;;  %v893_v30 = vcvt.s32.f32 %v886_v5 }
 0x174   :  { %v678_v27 = vor.u32 %v677_v2, %v676_v25  ;;  %v681_v28 = vshll.u32 %v680_v63, 23  ;;  %v767_v1 = vadd.s32 %v766_v26, %v762_v9  ;;  %v988_v7 = vshll.u32 %v3426_v36, %v3518_v62 }
 0x175   :  { %v994_v18 = vor.u32 4788187, %v993_v56  ;;  %v2590_v12 = vmov 27   ;;  %v894_v49 = vmul.f32 %v893_v30, %v891_v15  ;;  %vm813_vm2 = vcmp.lt.s32.totalorder %v4274_v10, 0 }
 0x176   :  { %v682_v41 = vor.u32 4788187, %v681_v28  ;;  %v768_v8 = vadd.s32 536870912, %v767_v1  ;;  %2426 = vset.pattern.permute.xlu0 %v2590_v12  ;;  %2427 = vset.pattern.permute.xlu1 %v2590_v12  ;;  %v990_v52 = vor.u32 %v989_v45, %v988_v7  ;;  %v685_v53 = vcvt.s32.f32 %v678_v27 }
 0x177   :  { %1627 = vperm.xlu0 %2426, %v3573_v50   ;;  %1632 = vperm.xlu1 %2427, %v3577_v6   ;;  %v995_v36 = vand.u32 2147483647, %v994_v18  ;;  %v895_v34 = vxor.u32 2147483648, %v894_v49  ;;  %vm605_vm6 = vcmp.lt.s32.totalorder %v4266_v46, 0  ;;  %v4275_v40 = vand.u32 2147483647, %v4274_v10 }
 0x178   :  { %v683_v19 = vand.u32 2147483647, %v682_v41  ;;  %v3583_v23 = vshrl.u32 %v768_v8, 30  ;;  %v997_v43 = vcvt.s32.f32 %v990_v52  ;;  %vm3605_vm7 = vcmp.le.f32.partialorder %v603_v44, 0.7853982 }
 0x179   :  { %v896_v38 = vsel %vm813_vm2, %v895_v34, %v894_v49  ;;  %vm3596_vm5 = vcmp.le.f32.partialorder %v4275_v40, 0.7853982  ;;  %vm917_vm8 = vcmp.lt.s32.totalorder %v2707_v35, 0  ;;  %v689_v11 = vsub.s32 4, %v3492_v33 }
 0x17a   :  { %v686_v62 = vmul.f32 %v685_v53, %v683_v19  ;;  %v770_v24 = vshll.u32 %v3583_v23, 30  ;;  %v998_v37 = vmul.f32 %v997_v43, %v995_v36  ;;  %v899_v4 = vsel %vm3596_vm5, %v4274_v10, %v896_v38 }
 0x17b   :  { %1642 = vperm.xlu0 %2426, %v3566_v22   ;;  %1637 = vperm.xlu1 %2427, %v3564_v39   ;;  %2462 = vcosq.f32 %v899_v4  ;;  %v897_v25 = vsub.s32 4, %v3299_v13  ;;  %vm3619_vm4 = vcmp.le.f32.partialorder %v915_v42, 0.7853982  ;;  %v763_v63 = vadd.s32 %v3551_v17, %v3533_v60  ;;  %v1826_v39 = vld [vmem:[#allocation5 + $0x98] sm:$0xff]  ;;  %v3688_v22 = vld [vmem:[#allocation5 + $0xa0] sm:$0xff] }
 0x17c   :  { %v771_v55 = vsub.s32 %v767_v1, %v770_v24  ;;  %v687_v21 = vxor.u32 2147483648, %v686_v62  ;;  %v999_v16 = vxor.u32 2147483648, %v998_v37  ;;  %v1001_v26 = vsub.s32 4, %v3399_v47 }
 0x17d   :  { %v690_v42 = vsel %vm605_vm6, %v689_v11, %v3492_v33  ;;  %v898_v60 = vsel %vm813_vm2, %v897_v25, %v3299_v13  ;;  %v793_v34 = vsub.s32 4, %v3583_v23  ;;  %vm709_vm10 = vcmp.lt.s32.totalorder %v4267_v54, 0 }
 0x17e   :  { %v773_v31 = vsub.s32 0, %v771_v55  ;;  %v688_v57 = vsel %vm605_vm6, %v687_v21, %v686_v62  ;;  %v1000_v51 = vsel %vm917_vm8, %v999_v16, %v998_v37  ;;  %v692_v7 = vsel %vm3605_vm7, 0, %v690_v42  ;;  %v1033_v42 = vpop.permute.xlu1 %1032 }
 0x17f   :  { %v691_v5 = vsel %vm3605_vm7, %v4266_v46, %v688_v57  ;;  %v1003_v45 = vsel %vm3619_vm4, %v2707_v35, %v1000_v51  ;;  %v1002_v18 = vsel %vm917_vm8, %v1001_v26, %v3399_v47  ;;  %v900_v33 = vsel %vm3596_vm5, 0, %v898_v60 }
 0x180   :  { %v2291_v59 = vmin.u32 %v773_v31, %v771_v55  ;;  %2464 = vcosq.f32 %v691_v5  ;;  %v696_v49 = vadd.s32 3, %v692_v7  ;;  %v1004_v53 = vsel %vm3619_vm4, 0, %v1002_v18 }
 0x181   :  { %2466 = vsinq.f32 %v691_v5  ;;  %v904_v62 = vadd.s32 3, %v900_v33  ;;  %vm3648_vm11 = vcmp.le.f32.partialorder %v707_v29, 0.7853982  ;;  %v794_v20 = vsel %vm709_vm10, %v793_v34, %v3583_v23 }
 0x182   :  { %v775_v61 = vclz %v2291_v59  ;;  %2468 = vsinq.f32 %v899_v4  ;;  %v697_v47 = vand.u32 3, %v696_v49  ;;  %v796_v29 = vsel %vm3648_vm11, 0, %v794_v20 }
 0x183   :  { %2470 = vcosq.f32 %v1003_v45  ;;  %v905_v59 = vand.u32 3, %v904_v62  ;;  %vm695_vm6 = vweird.f32 %v4266_v46  ;;  %vm903_vm5 = vweird.f32 %v4274_v10 }
 0x184   :  { %v2292_v56 = vadd.s32 4294967294, %v775_v61  ;;  %2472 = vsinq.f32 %v1003_v45  ;;  %vm699_vm12 = vcmp.eq.s32.totalorder %v697_v47, 0  ;;  %vm702_vm15 = vcmp.eq.s32.totalorder %v697_v47, 2 }
 0x185   :  { %v2463_v8 = vpop.eup %2462  ;;  %vm907_vm13 = vcmp.eq.s32.totalorder %v905_v59, 0  ;;  %vm910_vm14 = vcmp.eq.s32.totalorder %v905_v59, 2  ;;  %vm698_vm0 = vcmp.lt.s32.totalorder %v697_v47, 2  ;;  %vm906_vm3 = vcmp.lt.s32.totalorder %v905_v59, 2 }
 0x186   :  { %vm2293_vm9 = vcmp.lt.s32.totalorder %v2292_v56, 0  ;;  %v911_v4 = vxor.u32 2147483648, %v2463_v8  ;;  %vm1007_vm8 = vweird.f32 %v2707_v35  ;;  %v2591_v35 = vmov 65535  }
 0x187   :  { %v778_v2 = vsel %vm2293_vm9, 0, %v2292_v56 }
 0x188   :  { %v779_v9 = vsub.s32 32, %v778_v2  ;;  %v783_v15 = vsub.s32 4294967266, %v778_v2  ;;  %v780_v27 = vshll.u32 %v771_v55, %v778_v2  ;;  %v1008_v55 = vadd.s32 3, %v1004_v53 }
 0x18a   :  { %v781_v28 = vshrl.u32 %v763_v63, %v779_v9  ;;  %v784_v1 = vadd.s32 127, %v783_v15  ;;  %v2465_v13 = vpop.eup %2464  ;;  %v1009_v5 = vand.u32 3, %v1008_v55  ;;  %v800_v63 = vadd.s32 3, %v796_v29  ;;  %v1029_v9 = vpop.permute.xlu0 %1028  ;;  %v3684_v29 = vld [vmem:[#allocation5 + $0x68] sm:$0xff] }
 0x18b   :  { %v2467_v36 = vpop.eup %2466  ;;  %v703_v31 = vxor.u32 2147483648, %v2465_v13 }
 0x18c   :  { %v782_v17 = vor.u32 %v781_v28, %v780_v27  ;;  %v785_v30 = vshll.u32 %v784_v1, 23  ;;  %v2469_v43 = vpop.eup %2468  ;;  %v700_v37 = vxor.u32 2147483648, %v2467_v36  ;;  %vm1011_vm1 = vcmp.eq.s32.totalorder %v1009_v5, 0 }
 0x18d   :  { %v2471_v38 = vpop.eup %2470  ;;  %v908_v61 = vxor.u32 2147483648, %v2469_v43  ;;  %v704_v51 = vsel %vm702_vm15, %v703_v31, %v2467_v36  ;;  %v912_v44 = vsel %vm910_vm14, %v911_v4, %v2469_v43  ;;  %vm1014_vm2 = vcmp.eq.s32.totalorder %v1009_v5, 2  ;;  %v4287_v31 = vld [vmem:[#allocation15_spill] sm:$0xff] }
 0x18e   :  { %v786_v41 = vor.u32 4788187, %v785_v30  ;;  %v789_v19 = vcvt.s32.f32 %v782_v17  ;;  %v2473_v16 = vpop.eup %2472  ;;  %v701_v56 = vsel %vm699_vm12, %v2465_v13, %v700_v37  ;;  %v1015_v11 = vxor.u32 2147483648, %v2471_v38  ;;  %v1060_v17 = vpop.permute.xlu0 %1059  ;;  %v4285_v13 = vld [vmem:[#allocation14_spill] sm:$0xff] }
 0x18f   :  { %v1012_v23 = vxor.u32 2147483648, %v2473_v16  ;;  %v909_v25 = vsel %vm907_vm13, %v2463_v8, %v908_v61  ;;  %v705_v2 = vsel %vm698_vm0, %v701_v56, %v704_v51  ;;  %vm1010_vm7 = vcmp.lt.s32.totalorder %v1009_v5, 2  ;;  %v1065_v8 = vpop.permute.xlu1 %1064  ;;  %v3676_v56 = vld [vmem:[#allocation5 + $0x50] sm:$0xff]  ;;  %v3678_v51 = vld [vmem:[#allocation5 + $0x58] sm:$0xff] }
 0x190   :  { %v787_v52 = vand.u32 2147483647, %v786_v41  ;;  %v913_v15 = vsel %vm906_vm3, %v909_v25, %v912_v44  ;;  %v1016_v45 = vsel %vm1014_vm2, %v1015_v11, %v2473_v16  ;;  %v706_v27 = vsel %vm695_vm6, nan, %v705_v2  ;;  %v4284_v41 = vld [vmem:[#allocation12_spill] sm:$0xff]  ;;  %v3696_v25 = vld [vmem:[#allocation5 + $0x20] sm:$0xff] }
 0x191   :  { %v1013_v26 = vsel %vm1011_vm1, %v2471_v38, %v1012_v23  ;;  %v801_v28 = vand.u32 3, %v800_v63  ;;  %v914_v1 = vsel %vm903_vm5, nan, %v913_v15  ;;  %v1071_v7 = vmul.f32 %v1060_v17, %v706_v27  ;;  %v3701_v44 = vld [vmem:[#allocation5 + $0x28] sm:$0x7f] }
 0x192   :  { %v790_v24 = vmul.f32 %v789_v19, %v787_v52  ;;  %v1017_v60 = vsel %vm1010_vm7, %v1013_v26, %v1016_v45  ;;  %v1039_v33 = vmul.f32 %v1029_v9, %v4284_v41  ;;  %v1073_v46 = vmul.f32 %v1065_v8, %v914_v1 }
 0x193   :  { %v1018_v52 = vsel %vm1007_vm8, nan, %v1017_v60  ;;  %vm806_vm9 = vcmp.eq.s32.totalorder %v801_v28, 2  ;;  %vm803_vm4 = vcmp.eq.s32.totalorder %v801_v28, 0  ;;  %v1041_v53 = vmul.f32 %v1033_v42, %v4285_v13 }
 0x194   :  { %v791_v21 = vxor.u32 2147483648, %v790_v24  ;;  %v1079_v62 = vadd.f32 %v1071_v7, %v1039_v33  ;;  %vm799_vm12 = vweird.f32 %v4267_v54  ;;  %vm1653_vm15 = vcmask 1045504  }
 0x195   :  { %v1081_v43 = vadd.f32 %v1073_v46, %v1041_v53  ;;  %v1042_v38 = vmul.f32 %v1033_v42, %v4287_v31  ;;  %vm1645_vm13 = vcmask 220160   ;;  %v4288_v5 = vmov 0  }
 0x196   :  { %v792_v40 = vsel %vm709_vm10, %v791_v21, %v790_v24  ;;  %vm1652_vm10 = vcmask 1044480   ;;  %v1074_v24 = vmul.f32 %v1065_v8, %v1018_v52  ;;  %v4286_v21 = vld [vmem:[#allocation13_spill] sm:$0xff]  ;;  %v2592_v11 = vmov 32  }
 0x197   :  { %v795_v58 = vsel %vm3648_vm11, %v4267_v54, %v792_v40  ;;  %vm802_vm11 = vcmp.lt.s32.totalorder %v801_v28, 2  ;;  %v1654_v47 = vsel %vm1652_vm10, 4294967295, %v2591_v35  ;;  %v1040_v37 = vmul.f32 %v1029_v9, %v4286_v21  ;;  %2428 = vset.pattern.permute.xlu1 %v2592_v11  ;;  %2429 = vset.pattern.permute.xlu0 %v2592_v11 }
 0x198   :  { %2474 = vcosq.f32 %v795_v58  ;;  %v1623_v57 = vpack.c.bf16 %v1081_v43, %v1079_v62  ;;  %v1082_v40 = vadd.f32 %v1074_v24, %v1042_v38  ;;  %v1655_v16 = vsel %vm1653_vm15, %v1654_v47, 0  ;;  %1735 = vperm.xlu1 %2428, %v3676_v56   ;;  %1740 = vperm.xlu0 %2429, %v3678_v51  }
 0x199   :  { %2476 = vsinq.f32 %v795_v58  ;;  %v1619_v54 = vpack.c.bf16 %v3577_v6, %v3573_v50  ;;  %v1727_v50 = vpack.c.bf16 %v3678_v51, %v3676_v56  ;;  %v3682_v6 = vld [vmem:[#allocation5 + $0x60] sm:$0xff]  ;;  %v4289_v2 = vmov 1   ;;  %v4293_v51 = vld [vmem:[#allocation11_spill] sm:$0xff] }
 0x19a   :  { %v1657_v4 = vand.u32 %v1655_v16, %v1623_v57  ;;  %v1728_v23 = vpack.c.bf16 %v3684_v29, %v3682_v6  ;;  %v4290_v63 = vmov 3   ;;  %v4291_v9 = vmov 4   ;;  %v1828_v57 = vld [vmem:[#allocation5 + $0xa8] sm:$0xff] }
 0x19b   :  { %v4292_v15 = vmov 2   ;;  %vm1753_vm14 = vcmask 261120  }
 0x19c   :  { %1745 = vperm.xlu1 %2428, %v3682_v6   ;;  %2430 = vset.pattern.permute.xlu0 %v4288_v5 }
 0x19d   :  { %1087 = vperm.xlu0 %2430, %v3696_v25  }
 0x1a0   :  { %1750 = vperm.xlu1 %2428, %v3684_v29   ;;  %v41_v29 = vld [vmem:[#allocation2] sm:$0x38] }
 0x1a1   :  { %2433 = vset.pattern.permute.xlu0 %v4289_v2 }
 0x1a2   :  { %v2475_v30 = vpop.eup %2474  ;;  %1112 = vperm.xlu0 %2433, %v3701_v44  }
 0x1a3   :  { %v2477_v18 = vpop.eup %2476  ;;  %v807_v49 = vxor.u32 2147483648, %v2475_v30 }
 0x1a4   :  { %v804_v19 = vxor.u32 2147483648, %v2477_v18  ;;  %2431 = vset.pattern.permute.xlu1 %v4288_v5 }
 0x1a5   :  { %v808_v10 = vsel %vm806_vm9, %v807_v49, %v2477_v18  ;;  %1092 = vperm.xlu1 %2431, %v3701_v44  }
 0x1a6   :  { %v805_v36 = vsel %vm803_vm4, %v2475_v30, %v804_v19  ;;  %2435 = vset.pattern.permute.xlu0 %v4290_v63 }
 0x1a7   :  { %v809_v34 = vsel %vm802_vm11, %v805_v36, %v808_v10  ;;  %1156 = vperm.xlu0 %2435, %v3696_v25  }
 0x1a8   :  { %v810_v55 = vsel %vm799_vm12, nan, %v809_v34 }
 0x1a9   :  { %v1072_v59 = vmul.f32 %v1060_v17, %v810_v55  ;;  %2432 = vset.pattern.permute.xlu1 %v4289_v2  ;;  %v1141_v2 = vsub.s32 5, %v4293_v51 }
 0x1aa   :  { %1108 = vperm.xlu1 %2432, %v3696_v25  }
 0x1ab   :  { %v1080_v20 = vadd.f32 %v1072_v59, %v1040_v37  ;;  %2438 = vset.pattern.permute.xlu0 %v4291_v9  ;;  %v1595_v59 = vsub.f32 1.0, %v3696_v25 }
 0x1ac   :  { %1588 = vperm.xlu0 %2438, %v3701_v44  }
 0x1ad   :  { %v1624_v61 = vpack.c.bf16 %v1082_v40, %v1080_v20  ;;  %v1829_v40 = vld [vmem:[#allocation5 + $0xb0] sm:$0xff] }
 0x1ae   :  { %2434 = vset.pattern.permute.xlu1 %v4292_v15  ;;  %v1839_v20 = vpack.c.bf16 %v1829_v40, %v1828_v57 }
 0x1af   :  { %v1660_v58 = vand.u32 %v1655_v16, %v1624_v61  ;;  %1132 = vperm.xlu1 %2434, %v3696_v25   ;;  %v1596_v16 = vsub.f32 1.0, %v3701_v44 }
 0x1b0   :  { %2439 = vset.pattern.permute.xlu0 %v2590_v12 }
 0x1b1   :  { %1664 = vmatprep.subr.bf16.mxu1 %v1660_v58  ;;  %1852 = vmatprep.subr.bf16.mxu0 %v1660_v58 }
 0x1b2   :  { %1665 = vmatpush1.bf16.msra.mxu1 %v1657_v4  ;;  %1853 = vmatpush1.bf16.msra.mxu0 %v1657_v4  ;;  %v3737_v4 = vld [vmem:[#allocation5 + $0xb8] sm:$0x1] }
 0x1b3   :  { %1983 = vperm.xlu0 %2439, %v1826_v39   ;;  %1136 = vperm.xlu1 %2434, %v3701_v44   ;;  %v1840_v58 = vpack.c.bf16 %v3737_v4, %v3737_v4 }
 0x1b5   :  { %2318 = vmatmul.mubr.msk.bf16.vlgmr.msra.gmra.mrb[0].mxu1 %vm1645_vm13, %v1619_v54 }
 0x1b6   :  { %1704 = vmatprep.mubr.bf16.mxu1 %v4288_v5 }
 0x1b7   :  { %2436 = vset.pattern.permute.xlu1 %v4290_v63  ;;  %1998 = vperm.xlu0 %2439, %v1829_v40   ;;  %v3754_v63 = vld [vmem:[#allocation5 + $0xd0] sm:$0xff] }
 0x1b8   :  { %1160 = vperm.xlu1 %2436, %v3701_v44  }
 0x1bc   :  { %2437 = vset.pattern.permute.xlu1 %v4291_v9  ;;  %v3756_v9 = vld [vmem:[#allocation5 + $0xd8] sm:$0xff] }
 0x1bd   :  { %2319 = vmatmul.mubr.msk.bf16.gmra.mrb[4].mxu1 %vm1645_vm13, %v1620_v48  ;;  %v1838_v48 = vpack.c.bf16 %v3688_v22, %v1826_v39  ;;  %1584 = vperm.xlu1 %2437, %v3696_v25  }
 0x1be   :  { %1792 = vmatprep.mubr.bf16.mxu1 %v4288_v5 }
 0x1bf   :  { %2322 = vmatmul.mubr.msk.bf16.vlgmr.msra.gmra.mrb[0].mxu0 %vm1645_vm13, %v1838_v48 }
 0x1c0   :  { %1892 = vmatprep.mubr.bf16.mxu0 %v4288_v5 }
 0x1c1   :  { %1599 = vperm.xlu1 %2437, %v1595_v59  }
 0x1c5   :  { %1604 = vperm.xlu1 %2437, %v1596_v16  }
 0x1c7   :  { %2323 = vmatmul.mubr.msk.bf16.gmra.mrb[4].mxu0 %vm1645_vm13, %v1839_v20 }
 0x1c8   :  { %1902 = vmatprep.mubr.bf16.mxu0 %v4288_v5 }
 0x1c9   :  { %2440 = vset.pattern.permute.xlu1 %v2590_v12 }
 0x1ca   :  { %1988 = vperm.xlu1 %2440, %v3688_v22   ;;  %v1117_v22 = vsub.s32 4, %v4293_v51 }
 0x1ce   :  { %1993 = vperm.xlu1 %2440, %v1828_v57  }
 0x1cf   :  { %2324 = vmatmul.mubr.msk.bf16.gmra.mrb[8].mxu0 %vm1645_vm13, %v1840_v58 }
 0x1d0   :  { %1952 = vmatprep.mubr.bf16.mxu0 %v4288_v5 }
 0x1f6   :  { %v1628_v26 = vpop.permute.xlu0 %1627  ;;  %v1633_v42 = vpop.permute.xlu1 %1632 }
 0x1fa   :  { %v1638_v49 = vpop.permute.xlu1 %1637  ;;  %v1643_v53 = vpop.permute.xlu0 %1642 }
 0x217   :  { %v3735_v61 = vpop.permute.xlu1 %1735  ;;  %v3750_v11 = vpop.permute.xlu0 %1740 }
 0x21b   :  { %v3745_v54 = vpop.permute.xlu1 %1745 }
 0x21c   :  { %v1088_v44 = vpop.permute.xlu0 %1087 }
 0x21f   :  { %v3747_v56 = vpop.permute.xlu1 %1750 }
 0x224   :  { %v1093_v6 = vpop.permute.xlu1 %1092 }
 0x229   :  { %v1109_v25 = vpop.permute.xlu1 %1108 }
 0x288   :  { %v1696_v45 = vpop.f32.mrb[0].mxu1 }
 0x289   :  { %v1697_v27 = vadd.f32 %v1696_v45, %v1628_v26  ;;  %v1698_v28 = vpop.f32.mrb[1].mxu1  ;;  %v2593_v45 = vmov 15  }
 0x28a   :  { %v1699_v1 = vadd.f32 %v1698_v28, %v1628_v26  ;;  %v1700_v60 = vpop.f32.mrb[2].mxu1  ;;  %2441 = vset.pattern.permute.xlu1 %v2593_v45  ;;  %2442 = vset.pattern.permute.xlu0 %v2593_v45 }
 0x28b   :  { %v1701_v17 = vadd.f32 %v1700_v60, %v1633_v42  ;;  %v1702_v30 = vpop.f32.mrb[3].mxu1  ;;  %v1715_v18 = vmax.f32 %v1697_v27, 0.0  ;;  %v1118_v27 = vrot.slane %v41_v29, %v1117_v22  ;;  %2143 = vperm.xlu1 %2441, %v3754_v63   ;;  %2148 = vperm.xlu0 %2442, %v3756_v9  }
 0x28c   :  { %v1703_v7 = vadd.f32 %v1702_v30, %v1633_v42  ;;  %v1716_v33 = vmax.f32 %v1699_v1, 0.0  ;;  %v2035_v42 = vpack.c.bf16 %v3756_v9, %v3754_v63  ;;  %v1142_v1 = vrot.slane %v41_v29, %v1141_v2 }
 0x28d   :  { %v1717_v41 = vmax.f32 %v1701_v17, 0.0 }
 0x28e   :  { %v1718_v8 = vmax.f32 %v1703_v7, 0.0  ;;  %v1123_v7 = vmul.f32 %v1118_v27, %v1109_v25 }
 0x28f   :  { %v1729_v52 = vpack.c.bf16 %v1717_v41, %v1715_v18  ;;  %v1133_v41 = vpop.permute.xlu1 %1132 }
 0x290   :  { %v1730_v46 = vpack.c.bf16 %v1718_v8, %v1716_v33  ;;  %v1706_v19 = vpop.f32.mrb[4].mxu1  ;;  %v1113_v33 = vpop.permute.xlu0 %1112  ;;  %v2159_v8 = vld [vmem:[#allocation5 + $0xe0] sm:$0x7] }
 0x291   :  { %v1707_v10 = vadd.f32 %v1706_v19, %v1638_v49  ;;  %v1708_v13 = vpop.f32.mrb[5].mxu1 }
 0x292   :  { %v1709_v36 = vadd.f32 %v1708_v13, %v1638_v49  ;;  %v1710_v62 = vpop.f32.mrb[6].mxu1  ;;  %1760 = vmatprep.subr.bf16.mxu1 %v1730_v46  ;;  %v1147_v49 = vmul.f32 %v1142_v1, %v1133_v41  ;;  %v1125_v46 = vmul.f32 %v1118_v27, %v1113_v33 }
 0x293   :  { %v1711_v24 = vadd.f32 %v1710_v62, %v1643_v53  ;;  %v1712_v34 = vpop.f32.mrb[7].mxu1  ;;  %1761 = vmatpush1.bf16.msra.mxu1 %v1729_v52  ;;  %v1719_v55 = vmax.f32 %v1707_v10, 0.0 }
 0x294   :  { %v1713_v43 = vadd.f32 %v1712_v34, %v1643_v53  ;;  %v1720_v21 = vmax.f32 %v1709_v36, 0.0  ;;  %v2594_v53 = vmov 16   ;;  %v1157_v34 = vpop.permute.xlu0 %1156 }
 0x295   :  { %v1721_v47 = vmax.f32 %v1711_v24, 0.0  ;;  %2443 = vset.pattern.permute.xlu1 %v2594_v53  ;;  %2445 = vset.pattern.permute.xlu0 %v2594_v53  ;;  %v1137_v24 = vpop.permute.xlu1 %1136 }
 0x296   :  { %v1722_v37 = vmax.f32 %v1713_v43, 0.0  ;;  %2165 = vperm.xlu1 %2443, %v2159_v8  }
 0x297   :  { %v1731_v31 = vpack.c.bf16 %v1721_v47, %v1719_v55  ;;  %v1149_v47 = vmul.f32 %v1142_v1, %v1137_v24 }
 0x298   :  { %v1732_v38 = vpack.c.bf16 %v1722_v37, %v1720_v21 }
 0x299   :  { %v1161_v20 = vpop.permute.xlu1 %1160 }
 0x29a   :  { %1762 = vmatprep.subr.bf16.mxu1 %v1732_v38  ;;  %2444 = vset.pattern.permute.xlu1 %v2590_v12 }
 0x29b   :  { %1763 = vmatpush1.bf16.msra.mxu1 %v1731_v31  ;;  %2003 = vperm.xlu1 %2444, %v3737_v4  }
 0x29e   :  { %2320 = vmatmul.mubr.msk.bf16.vlgmr.msra.gmra.mrb[8].mxu1 %vm1753_vm14, %v1727_v50  ;;  %v1097_v50 = vsub.s32 3, %v4293_v51 }
 0x29f   :  { %1802 = vmatprep.mubr.bf16.mxu1 %v4288_v5 }
 0x2a0   :  { %v1098_v39 = vrot.slane %v41_v29, %v1097_v50 }
 0x2a2   :  { %v1103_v15 = vmul.f32 %v1098_v39, %v1088_v44  ;;  %v1105_v17 = vmul.f32 %v1098_v39, %v1093_v6 }
 0x2a4   :  { %v1127_v10 = vadd.f32 %v1123_v7, %v1103_v15  ;;  %v1129_v36 = vadd.f32 %v1125_v46, %v1105_v17 }
 0x2a6   :  { %2321 = vmatmul.mubr.msk.bf16.gmra.mrb[12].mxu1 %vm1753_vm14, %v1728_v23  ;;  %v42_v23 = vld [vmem:[#allocation2 + $0x8] sm:$0x38]  ;;  %v3762_v43 = vadd.f32 %v1147_v49, %v1127_v10  ;;  %v3772_v38 = vadd.f32 %v1149_v47, %v1129_v36  ;;  %v4295_v10 = vmov 1326507024  }
 0x2a7   :  { %2084 = vmatprep.mubr.bf16.mxu1 %v4288_v5  ;;  %v1102_v48 = vrot.slane %v42_v23, %v1097_v50  ;;  %v1122_v28 = vrot.slane %v42_v23, %v1117_v22  ;;  %v1146_v60 = vrot.slane %v42_v23, %v1141_v2 }
 0x2a8   :  { %v3767_v37 = vadd.f32 %v1157_v34, %v3762_v43  ;;  %v3781_v16 = vadd.f32 %v1161_v20, %v3772_v38 }
 0x2a9   :  { %v1104_v26 = vmul.f32 %v1102_v48, %v1088_v44  ;;  %v1106_v30 = vmul.f32 %v1102_v48, %v1093_v6  ;;  %v1124_v18 = vmul.f32 %v1122_v28, %v1109_v25  ;;  %v1148_v52 = vmul.f32 %v1146_v60, %v1133_v41 }
 0x2aa   :  { %v1126_v19 = vmul.f32 %v1122_v28, %v1113_v33  ;;  %v1150_v21 = vmul.f32 %v1146_v60, %v1137_v24  ;;  %v1170_v57 = vand.u32 2139095040, %v3767_v37  ;;  %v1378_v29 = vand.u32 2139095040, %v3781_v16 }
 0x2ab   :  { %v1128_v13 = vadd.f32 %v1124_v18, %v1104_v26  ;;  %v1167_v44 = vand.u32 2147483647, %v3767_v37  ;;  %v4294_v33 = vmov 920167782  }
 0x2ac   :  { %v1130_v62 = vadd.f32 %v1126_v19, %v1106_v30  ;;  %v1171_v58 = vshrl.u32 %v1170_v57, 23  ;;  %v1379_v12 = vshrl.u32 %v1378_v29, 23 }
 0x2ad   :  { %v3764_v55 = vadd.f32 %v1148_v52, %v1128_v13  ;;  %v1174_v1 = vand.u32 8388607, %v1167_v44 }
 0x2ae   :  { %v3774_v59 = vadd.f32 %v1150_v21, %v1130_v62  ;;  %v2302_v23 = vadd.s32 4294967169, %v1171_v58  ;;  %v2310_v4 = vadd.s32 4294967169, %v1379_v12 }
 0x2af   :  { %v3770_v31 = vadd.f32 %v1157_v34, %v3764_v55  ;;  %v1175_v18 = vor.u32 8388608, %v1174_v1 }
 0x2b0   :  { %v3784_v6 = vadd.f32 %v1161_v20, %v3774_v59  ;;  %v1177_v48 = vadd.s32 1, %v2302_v23  ;;  %v1385_v26 = vadd.s32 1, %v2310_v4 }
 0x2b1   :  { %v1274_v40 = vand.u32 2139095040, %v3770_v31  ;;  %v1271_v60 = vand.u32 2147483647, %v3770_v31 }
 0x2b2   :  { %v1482_v25 = vand.u32 2139095040, %v3784_v6  ;;  %vm1178_vm0 = vcmp.gt.s32.totalorder %v1177_v48, 0  ;;  %vm1386_vm1 = vcmp.gt.s32.totalorder %v1385_v26, 0 }
 0x2b3   :  { %v1275_v50 = vshrl.u32 %v1274_v40, 23  ;;  %v1179_v2 = vsel %vm1178_vm0, %v1177_v48, 0  ;;  %v1387_v49 = vsel %vm1386_vm1, %v1385_v26, 0  ;;  %v3801_v52 = vand.u32 8388607, %v1271_v60 }
 0x2b4   :  { %v1181_v45 = vand.u32 31, %v1179_v2  ;;  %v1483_v28 = vshrl.u32 %v1482_v25, 23  ;;  %v1180_v46 = vshrl.u32 %v1179_v2, 5  ;;  %v3815_v47 = vand.u32 31, %v1387_v49 }
 0x2b5   :  { %v2306_v39 = vadd.s32 4294967169, %v1275_v50  ;;  %v3819_v40 = vshll.u32 %v1175_v18, 8  ;;  %v1279_v20 = vor.u32 8388608, %v3801_v52  ;;  %v1375_v50 = vand.u32 2147483647, %v3781_v16 }
 0x2b6   :  { %v1182_v17 = vsub.s32 32, %v1181_v45  ;;  %v2314_v7 = vadd.s32 4294967169, %v1483_v28  ;;  %v1193_v41 = vshll.u32 %v4240_v14, %v1181_v45  ;;  %v1196_v19 = vshll.u32 %v4294_v33, %v1181_v45 }
 0x2b7   :  { %v1281_v22 = vadd.s32 1, %v2306_v39  ;;  %vm1202_vm2 = vcmp.lt.s32.totalorder %v1180_v46, 4  ;;  %v3824_v39 = vshrl.u32 %v1387_v49, 5  ;;  %v1184_v12 = vshll.u32 %v4236_v0, %v1181_v45 }
 0x2b8   :  { %v1194_v8 = vshrl.u32 %v4294_v33, %v1182_v17  ;;  %v1197_v13 = vshrl.u32 %v4295_v10, %v1182_v17  ;;  %v3817_v57 = vadd.s32 1, %v2314_v7  ;;  %v3828_v48 = vsub.s32 32, %v3815_v47 }
 0x2b9   :  { %vm1282_vm3 = vcmp.gt.s32.totalorder %v1281_v22, 0  ;;  %v1185_v25 = vshrl.u32 %v4237_v32, %v1182_v17  ;;  %v1187_v4 = vshll.u32 %v4237_v32, %v1181_v45  ;;  %v1188_v26 = vshrl.u32 %v4238_v3, %v1182_v17 }
 0x2ba   :  { %v1283_v15 = vsel %vm1282_vm3, %v1281_v22, 0  ;;  %v1195_v21 = vor.u32 %v1194_v8, %v1193_v41  ;;  %v1198_v58 = vor.u32 %v1197_v13, %v1196_v19  ;;  %v1401_v22 = vshll.u32 %v4240_v14, %v3815_v47 }
 0x2bb   :  { %v3789_v27 = vand.u32 31, %v1283_v15  ;;  %v3805_v53 = vshrl.u32 %v1283_v15, 5  ;;  %v1183_v15 = vshrl.u32 %v4236_v0, %v1182_v17  ;;  %v1190_v28 = vshll.u32 %v4238_v3, %v1181_v45 }
 0x2bc   :  { %v1208_v2 = vsel %vm1202_vm2, %v1195_v21, 920167782  ;;  %v1212_v1 = vsel %vm1202_vm2, %v1198_v58, 1326507024  ;;  %v3841_v7 = vshll.u32 %v4294_v33, %v3815_v47  ;;  %v1186_v18 = vor.u32 %v1185_v25, %v1184_v12 }
 0x2bd   :  { %v3795_v30 = vsub.s32 32, %v3789_v27  ;;  %v1297_v36 = vshll.u32 %v4240_v14, %v3789_v27  ;;  %v1300_v24 = vshll.u32 %v4294_v33, %v3789_v27  ;;  %vm1306_vm6 = vcmp.lt.s32.totalorder %v3805_v53, 4 }
 0x2be   :  { %v1191_v41 = vshrl.u32 %v4240_v14, %v1182_v17  ;;  %v1189_v49 = vor.u32 %v1188_v26, %v1187_v4  ;;  %vm1199_vm5 = vcmp.lt.s32.totalorder %v1180_v46, 1  ;;  %vm1201_vm7 = vcmp.lt.s32.totalorder %v1180_v46, 3 }
 0x2bf   :  { %v1298_v62 = vshrl.u32 %v4294_v33, %v3795_v30  ;;  %v1301_v34 = vshrl.u32 %v4295_v10, %v3795_v30  ;;  %v1402_v45 = vshrl.u32 %v4294_v33, %v3828_v48  ;;  %vm1200_vm8 = vcmp.lt.s32.totalorder %v1180_v46, 2 }
 0x2c0   :  { %v1192_v19 = vor.u32 %v1191_v41, %v1190_v28  ;;  %v1203_v13 = vsel %vm1199_vm5, %v1183_v15, %v1186_v18  ;;  %v1288_v17 = vshll.u32 %v4236_v0, %v3789_v27  ;;  %vm1410_vm9 = vcmp.lt.s32.totalorder %v3824_v39, 4 }
 0x2c1   :  { %v1299_v29 = vor.u32 %v1298_v62, %v1297_v36  ;;  %v1302_v23 = vor.u32 %v1301_v34, %v1300_v24  ;;  %v1207_v36 = vsel %vm1199_vm5, %v1186_v18, %v1189_v49  ;;  %v1213_v62 = vsel %vm1201_vm7, %v1195_v21, %v1212_v1 }
 0x2c2   :  { %v1204_v24 = vsel %vm1202_vm2, %v1192_v19, 2102212464  ;;  %v1209_v34 = vsel %vm1201_vm7, %v1192_v19, %v1208_v2  ;;  %v1211_v58 = vsel %vm1199_vm5, %v1189_v49, %v1192_v19  ;;  %v1291_v15 = vshll.u32 %v4237_v32, %v3789_v27 }
 0x2c3   :  { %v1312_v8 = vsel %vm1306_vm6, %v1299_v29, 920167782  ;;  %v1316_v52 = vsel %vm1306_vm6, %v1302_v23, 1326507024  ;;  %v1289_v23 = vshrl.u32 %v4237_v32, %v3795_v30  ;;  %v1205_v12 = vsel %vm1201_vm7, %v1189_v49, %v1204_v24 }
 0x2c4   :  { %v1210_v25 = vsel %vm1200_vm8, %v1207_v36, %v1209_v34  ;;  %v1214_v4 = vsel %vm1200_vm8, %v1211_v58, %v1213_v62  ;;  %v1206_v26 = vsel %vm1200_vm8, %v1203_v13, %v1205_v12  ;;  %v1287_v46 = vshrl.u32 %v4236_v0, %v3795_v30 }
 0x2c5   :  { %v3859_v21 = vmul.u32.u64.low %v3819_v40, %v1214_v4  ;;  %v3860_v28 = vmul.u32.u64.high %v3819_v40, %v1214_v4, %v3859_v21  ;;  %v3865_v2 = vmul.u32.u64.low %v3819_v40, %v1210_v25  ;;  %v3866_v1 = vmul.u32.u64.high %v3819_v40, %v1210_v25, %v3865_v2 }
 0x2c6   :  { %v1290_v18 = vor.u32 %v1289_v23, %v1288_v17  ;;  %v1292_v41 = vshrl.u32 %v4238_v3, %v3795_v30  ;;  %v1405_v49 = vshrl.u32 %v4295_v10, %v3828_v48  ;;  %v1294_v19 = vshll.u32 %v4238_v3, %v3789_v27 }
 0x2c7   :  { %v1295_v13 = vshrl.u32 %v4240_v14, %v3795_v30  ;;  %vm1303_vm4 = vcmp.lt.s32.totalorder %v3805_v53, 1  ;;  %v1222_v36 = vmul.u32 %v3819_v40, %v1206_v26  ;;  %vm1304_vm10 = vcmp.lt.s32.totalorder %v3805_v53, 2 }
 0x2c8   :  { %v1293_v62 = vor.u32 %v1292_v41, %v1291_v15  ;;  %vm1305_vm11 = vcmp.lt.s32.totalorder %v3805_v53, 3  ;;  %vm1224_vm12 = vc.u32 %v3860_v28, %v3865_v2  ;;  %v1319_v34 = vshll.u32 %v1279_v20, 8 }
 0x2c9   :  { %v1296_v17 = vor.u32 %v1295_v13, %v1294_v19  ;;  %v1317_v24 = vsel %vm1305_vm11, %v1299_v29, %v1316_v52  ;;  %v1403_v58 = vor.u32 %v1402_v45, %v1401_v22  ;;  %v1225_v27 = vadd.s32 1, %v3866_v1 }
 0x2ca   :  { %v1307_v30 = vsel %vm1303_vm4, %v1287_v46, %v1290_v18  ;;  %v1311_v40 = vsel %vm1303_vm4, %v1290_v18, %v1293_v62  ;;  %v1406_v23 = vor.u32 %v1405_v49, %v3841_v7  ;;  %vm1490_vm15 = vcmp.gt.s32.totalorder %v3817_v57, 0 }
 0x2cb   :  { %v1308_v12 = vsel %vm1306_vm6, %v1296_v17, 2102212464  ;;  %v1313_v25 = vsel %vm1305_vm11, %v1296_v17, %v1312_v8  ;;  %v1315_v20 = vsel %vm1303_vm4, %v1293_v62, %v1296_v17  ;;  %v1226_v29 = vsel %vm1224_vm12, %v1225_v27, %v3866_v1 }
 0x2cc   :  { %v1309_v22 = vsel %vm1305_vm11, %v1293_v62, %v1308_v12  ;;  %v1314_v52 = vsel %vm1304_vm10, %v1311_v40, %v1313_v25  ;;  %v1318_v45 = vsel %vm1304_vm10, %v1315_v20, %v1317_v24  ;;  %v1227_v4 = vadd.s32 %v1226_v29, %v1222_v36 }
 0x2cd   :  { %v1310_v7 = vsel %vm1304_vm10, %v1307_v30, %v1309_v22  ;;  %v3901_v15 = vmul.u32.u64.low %v1319_v34, %v1318_v45  ;;  %v3902_v26 = vmul.u32.u64.high %v1319_v34, %v1318_v45, %v3901_v15  ;;  %v1416_v8 = vsel %vm1410_vm9, %v1403_v58, 920167782 }
 0x2ce   :  { %v3906_v21 = vmul.u32.u64.low %v1319_v34, %v1314_v52  ;;  %v3907_v46 = vmul.u32.u64.high %v1319_v34, %v1314_v52, %v3906_v21  ;;  %v1382_v1 = vand.u32 8388607, %v1375_v50  ;;  %v1228_v18 = vadd.s32 536870912, %v1227_v4 }
 0x2cf   :  { %v1392_v41 = vshll.u32 %v4236_v0, %v3815_v47  ;;  %v1393_v53 = vshrl.u32 %v4237_v32, %v3828_v48  ;;  %v1395_v49 = vshll.u32 %v4237_v32, %v3815_v47  ;;  %v1326_v19 = vmul.u32 %v1319_v34, %v1310_v7 }
 0x2d0   :  { %v1396_v13 = vshrl.u32 %v4238_v3, %v3828_v48  ;;  %v1398_v36 = vshll.u32 %v4238_v3, %v3815_v47  ;;  %v1399_v62 = vshrl.u32 %v4240_v14, %v3828_v48  ;;  %v3924_v17 = vshrl.u32 %v1228_v18, 30 }
 0x2d1   :  { %vm1328_vm13 = vc.u32 %v3902_v26, %v3906_v21  ;;  %v1394_v24 = vor.u32 %v1393_v53, %v1392_v41  ;;  %vm1407_vm0 = vcmp.lt.s32.totalorder %v3824_v39, 1  ;;  %v1420_v34 = vsel %vm1410_vm9, %v1406_v23, 1326507024 }
 0x2d2   :  { %v1329_v27 = vadd.s32 1, %v3907_v46  ;;  %v1397_v30 = vor.u32 %v1396_v13, %v1395_v49  ;;  %v1400_v40 = vor.u32 %v1399_v62, %v1398_v36  ;;  %v1230_v47 = vshll.u32 %v3924_v17, 30 }
 0x2d3   :  { %v1383_v12 = vor.u32 8388608, %v1382_v1  ;;  %v1391_v25 = vshrl.u32 %v4236_v0, %v3828_v48  ;;  %vm1409_vm3 = vcmp.lt.s32.totalorder %v3824_v39, 3  ;;  %vm1408_vm1 = vcmp.lt.s32.totalorder %v3824_v39, 2 }
 0x2d4   :  { %v1330_v20 = vsel %vm1328_vm13, %v1329_v27, %v3907_v46  ;;  %v1415_v29 = vsel %vm1407_vm0, %v1394_v24, %v1397_v30  ;;  %v1417_v23 = vsel %vm1409_vm3, %v1400_v40, %v1416_v8  ;;  %v1231_v22 = vsub.s32 %v1227_v4, %v1230_v47 }
 0x2d5   :  { %v1331_v52 = vadd.s32 %v1330_v20, %v1326_v19  ;;  %v1412_v45 = vsel %vm1410_vm9, %v1400_v40, 2102212464  ;;  %v1491_v7 = vsel %vm1490_vm15, %v3817_v57, 0  ;;  %v1419_v48 = vsel %vm1407_vm0, %v1397_v30, %v1400_v40 }
 0x2d6   :  { %v1233_v15 = vsub.s32 0, %v1231_v22  ;;  %v1418_v1 = vsel %vm1408_vm1, %v1415_v29, %v1417_v23  ;;  %v1421_v18 = vsel %vm1409_vm3, %v1403_v58, %v1420_v34  ;;  %v1411_v4 = vsel %vm1407_vm0, %v1391_v25, %v1394_v24 }
 0x2d7   :  { %v1332_v46 = vadd.s32 536870912, %v1331_v52  ;;  %v1413_v8 = vsel %vm1409_vm3, %v1397_v30, %v1412_v45  ;;  %v1422_v41 = vsel %vm1408_vm1, %v1419_v48, %v1421_v18  ;;  %v1423_v53 = vshll.u32 %v1383_v12, 8 }
 0x2d8   :  { %v2303_v49 = vmin.u32 %v1233_v15, %v1231_v22  ;;  %v1493_v27 = vand.u32 31, %v1491_v7  ;;  %v1414_v24 = vsel %vm1408_vm1, %v1411_v4, %v1413_v8  ;;  %v1223_v25 = vadd.s32 %v3865_v2, %v3860_v28 }
 0x2d9   :  { %v3953_v19 = vshrl.u32 %v1332_v46, 30  ;;  %v3955_v57 = vmul.u32.u64.low %v1423_v53, %v1422_v41  ;;  %v3956_v13 = vmul.u32.u64.high %v1423_v53, %v1422_v41, %v3955_v57  ;;  %v1430_v47 = vmul.u32 %v1423_v53, %v1414_v24 }
 0x2da   :  { %v3958_v36 = vmul.u32.u64.low %v1423_v53, %v1418_v1  ;;  %v3959_v62 = vmul.u32.u64.high %v1423_v53, %v1418_v1, %v3958_v36  ;;  %v1235_v58 = vclz %v2303_v49  ;;  %v1494_v12 = vsub.s32 32, %v1493_v27 }
 0x2db   :  { %v1334_v34 = vshll.u32 %v3953_v19, 30  ;;  %v3974_v15 = vshrl.u32 %v1491_v7, 5  ;;  %v1505_v46 = vshll.u32 %v4240_v14, %v1493_v27  ;;  %v1508_v2 = vshll.u32 %v4294_v33, %v1493_v27 }
 0x2dc   :  { %v2304_v30 = vadd.s32 4294967294, %v1235_v58  ;;  %vm1432_vm2 = vc.u32 %v3956_v13, %v3958_v36  ;;  %v1433_v20 = vadd.s32 1, %v3959_v62  ;;  %v1506_v28 = vshrl.u32 %v4294_v33, %v1494_v12 }
 0x2dd   :  { %v3965_v40 = vsub.s32 %v1331_v52, %v1334_v34  ;;  %v1509_v41 = vshrl.u32 %v4295_v10, %v1494_v12  ;;  %v1496_v49 = vshll.u32 %v4236_v0, %v1493_v27  ;;  %v1499_v58 = vshll.u32 %v4237_v32, %v1493_v27 }
 0x2de   :  { %vm2305_vm6 = vcmp.lt.s32.totalorder %v2304_v30, 0  ;;  %v1434_v52 = vsel %vm1432_vm2, %v1433_v20, %v3959_v62  ;;  %v1500_v34 = vshrl.u32 %v4238_v3, %v1494_v12  ;;  %v1503_v33 = vshrl.u32 %v4240_v14, %v1494_v12 }
 0x2df   :  { %v1238_v29 = vsel %vm2305_vm6, 0, %v2304_v30  ;;  %v1337_v39 = vsub.s32 0, %v3965_v40  ;;  %v1435_v18 = vadd.s32 %v1434_v52, %v1430_v47  ;;  %v1502_v30 = vshll.u32 %v4238_v3, %v1493_v27 }
 0x2e0   :  { %v1239_v23 = vsub.s32 32, %v1238_v29  ;;  %v1240_v45 = vshll.u32 %v1231_v22, %v1238_v29  ;;  %v1243_v48 = vsub.s32 4294967266, %v1238_v29  ;;  %v1479_v22 = vand.u32 2147483647, %v3784_v6 }
 0x2e1   :  { %v2307_v1 = vmin.u32 %v1337_v39, %v3965_v40  ;;  %v1436_v62 = vadd.s32 536870912, %v1435_v18  ;;  %v1497_v20 = vshrl.u32 %v4237_v32, %v1494_v12  ;;  %v1507_v29 = vor.u32 %v1506_v28, %v1505_v46 }
 0x2e2   :  { %v1241_v4 = vshrl.u32 %v1223_v25, %v1239_v23  ;;  %v1244_v8 = vadd.s32 127, %v1243_v48  ;;  %v1510_v39 = vor.u32 %v1509_v41, %v1508_v2  ;;  %vm1514_vm5 = vcmp.lt.s32.totalorder %v3974_v15, 4 }
 0x2e3   :  { %v1339_v53 = vclz %v2307_v1  ;;  %v3987_v10 = vshrl.u32 %v1436_v62, 30  ;;  %v1486_v48 = vand.u32 8388607, %v1479_v22  ;;  %v1501_v3 = vor.u32 %v1500_v34, %v1499_v58 }
 0x2e4   :  { %v1242_v7 = vor.u32 %v1241_v4, %v1240_v45  ;;  %v1245_v57 = vshll.u32 %v1244_v8, 23  ;;  %v1504_v27 = vor.u32 %v1503_v33, %v1502_v30  ;;  %v1498_v1 = vor.u32 %v1497_v20, %v1496_v49 }
 0x2e5   :  { %v2308_v24 = vadd.s32 4294967294, %v1339_v53  ;;  %v1438_v45 = vshll.u32 %v3987_v10, 30  ;;  %vm1511_vm8 = vcmp.lt.s32.totalorder %v3974_v15, 1  ;;  %vm1169_vm9 = vcmp.lt.s32.totalorder %v3767_v37, 0 }
 0x2e6   :  { %v1246_v47 = vor.u32 4788187, %v1245_v57  ;;  %v1249_v25 = vcvt.s32.f32 %v1242_v7  ;;  %v1520_v32 = vsel %vm1514_vm5, %v1507_v29, 920167782  ;;  %v1524_v46 = vsel %vm1514_vm5, %v1510_v39, 1326507024 }
 0x2e7   :  { %vm2309_vm7 = vcmp.lt.s32.totalorder %v2308_v24, 0  ;;  %v3994_v52 = vsub.s32 %v1435_v18, %v1438_v45  ;;  %vm1513_vm4 = vcmp.lt.s32.totalorder %v3974_v15, 3  ;;  %v1253_v28 = vsub.s32 4, %v3924_v17 }
 0x2e8   :  { %v1247_v23 = vand.u32 2147483647, %v1246_v47  ;;  %v4004_v2 = vsel %vm2309_vm7, 0, %v2308_v24  ;;  %v1495_v4 = vshrl.u32 %v4236_v0, %v1494_v12  ;;  %v1487_v41 = vor.u32 8388608, %v1486_v48 }
 0x2e9   :  { %v1441_v18 = vsub.s32 0, %v3994_v52  ;;  %vm1512_vm10 = vcmp.lt.s32.totalorder %v3974_v15, 2  ;;  %v1523_v53 = vsel %vm1511_vm8, %v1501_v3, %v1504_v27  ;;  %v1519_v7 = vsel %vm1511_vm8, %v1498_v1, %v1501_v3 }
 0x2ea   :  { %v1250_v14 = vmul.f32 %v1249_v25, %v1247_v23  ;;  %v1521_v57 = vsel %vm1513_vm4, %v1504_v27, %v1520_v32  ;;  %v1525_v62 = vsel %vm1513_vm4, %v1507_v29, %v1524_v46  ;;  %v1347_v0 = vsub.s32 4294967266, %v4004_v2 }
 0x2eb   :  { %v2311_v49 = vmin.u32 %v1441_v18, %v3994_v52  ;;  %v1516_v12 = vsel %vm1514_vm5, %v1504_v27, 2102212464  ;;  %vm4023_vm11 = vcmp.le.f32.partialorder %v1167_v44, 0.7853982  ;;  %v1327_v24 = vadd.s32 %v3906_v21, %v3902_v26 }
 0x2ec   :  { %v1251_v8 = vxor.u32 2147483648, %v1250_v14  ;;  %v1526_v30 = vsel %vm1512_vm10, %v1523_v53, %v1525_v62  ;;  %v4036_v47 = vsel %vm1169_vm9, %v1253_v28, %v3924_v17  ;;  %v1522_v44 = vsel %vm1512_vm10, %v1519_v7, %v1521_v57 }
 0x2ed   :  { %v1443_v34 = vclz %v2311_v49  ;;  %v1527_v25 = vshll.u32 %v1487_v41, 8  ;;  %v1431_v20 = vadd.s32 %v3958_v36, %v3956_v13  ;;  %v1515_v21 = vsel %vm1511_vm8, %v1495_v4, %v1498_v1 }
 0x2ee   :  { %v1252_v33 = vsel %vm1169_vm9, %v1251_v8, %v1250_v14  ;;  %v1517_v29 = vsel %vm1513_vm4, %v1501_v3, %v1516_v12  ;;  %v1343_v39 = vsub.s32 32, %v4004_v2  ;;  %v1348_v23 = vadd.s32 127, %v1347_v0 }
 0x2ef   :  { %v2312_v26 = vadd.s32 4294967294, %v1443_v34  ;;  %v4047_v45 = vmul.u32.u64.low %v1527_v25, %v1526_v30  ;;  %v4048_v17 = vmul.u32.u64.high %v1527_v25, %v1526_v30, %v4047_v45  ;;  %v1255_v27 = vsel %vm4023_vm11, %v3767_v37, %v1252_v33 }
 0x2f0   :  { %v4053_v13 = vmul.u32.u64.low %v1527_v25, %v1522_v44  ;;  %v4054_v36 = vmul.u32.u64.high %v1527_v25, %v1522_v44, %v4053_v13  ;;  %v1344_v3 = vshll.u32 %v3965_v40, %v4004_v2  ;;  %v1518_v46 = vsel %vm1512_vm10, %v1515_v21, %v1517_v29 }
 0x2f1   :  { %vm2313_vm12 = vcmp.lt.s32.totalorder %v2312_v26, 0  ;;  %2478 = vcosq.f32 %v1255_v27  ;;  %v1345_v7 = vshrl.u32 %v1327_v24, %v1343_v39  ;;  %v1349_v57 = vshll.u32 %v1348_v23, 23 }
 0x2f2   :  { %v1446_v32 = vsel %vm2313_vm12, 0, %v2312_v26  ;;  %2480 = vsinq.f32 %v1255_v27  ;;  %v1534_v2 = vmul.u32 %v1527_v25, %v1518_v46  ;;  %vm1536_vm15 = vc.u32 %v4048_v17, %v4053_v13 }
 0x2f3   :  { %v1447_v4 = vsub.s32 32, %v1446_v32  ;;  %v1448_v8 = vshll.u32 %v3994_v52, %v1446_v32  ;;  %v1451_v41 = vsub.s32 4294967266, %v1446_v32  ;;  %v1537_v30 = vadd.s32 1, %v4054_v36 }
 0x2f4   :  { %v1256_v24 = vsel %vm4023_vm11, 0, %v4036_v47  ;;  %v1346_v25 = vor.u32 %v1345_v7, %v1344_v3  ;;  %v1350_v26 = vor.u32 4788187, %v1349_v57  ;;  %v1461_v3 = vsub.s32 4, %v3987_v10 }
 0x2f5   :  { %v1449_v40 = vshrl.u32 %v1431_v20, %v1447_v4  ;;  %v1452_v12 = vadd.s32 127, %v1451_v41  ;;  %v1538_v21 = vsel %vm1536_vm15, %v1537_v30, %v4054_v36  ;;  %v1260_v36 = vadd.s32 3, %v1256_v24 }
 0x2f6   :  { %v1353_v46 = vcvt.s32.f32 %v1346_v25  ;;  %v1351_v41 = vand.u32 2147483647, %v1350_v26  ;;  %vm1377_vm13 = vcmp.lt.s32.totalorder %v3781_v16, 0  ;;  %vm4083_vm0 = vcmp.le.f32.partialorder %v1375_v50, 0.7853982  ;;  %v4097_v25 = vpop.permute.xlu1 %1584 }
 0x2f7   :  { %v1450_v34 = vor.u32 %v1449_v40, %v1448_v8  ;;  %v1821_v40 = vld [vmem:[#allocation5 + $0x70] sm:$0xff]  ;;  %vm1273_vm2 = vcmp.lt.s32.totalorder %v3770_v31, 0  ;;  %vm4105_vm5 = vcmp.le.f32.partialorder %v1271_v60, 0.7853982  ;;  %vm1259_vm7 = vweird.f32 %v3767_v37 }
 0x2f8   :  { %vm1467_vm8 = vweird.f32 %v3781_v16  ;;  %vm1481_vm12 = vcmp.lt.s32.totalorder %v3784_v6, 0  ;;  %vm1480_vm15 = vcmp.le.f32.partialorder %v1479_v22, 0.7853982 }
 0x2f9   :  { %v1457_v45 = vcvt.s32.f32 %v1450_v34  ;;  %v1354_v34 = vmul.f32 %v1353_v46, %v1351_v41  ;;  %v1825_v41 = vld [vmem:[#allocation5 + $0x90] sm:$0x1] }
 0x2fa   :  { %v4114_v46 = vpop.permute.xlu1 %1599 }
 0x2fb   :  { %v1355_v26 = vxor.u32 2147483648, %v1354_v34 }
 0x371   :  { %v1794_v48 = vpop.f32.mrb[8].mxu1 }
 0x372   :  { %v1795_v14 = vadd.f32 %v1794_v48, %v3735_v61  ;;  %v1796_v1 = vpop.f32.mrb[9].mxu1  ;;  %v1539_v48 = vadd.s32 %v1538_v21, %v1534_v2  ;;  %v1822_v2 = vld [vmem:[#allocation5 + $0x78] sm:$0xff] }
 0x373   :  { %v1797_v28 = vadd.f32 %v1796_v1, %v3735_v61  ;;  %v1798_v18 = vpop.f32.mrb[10].mxu1 }
 0x374   :  { %v1799_v53 = vadd.f32 %v1798_v18, %v3750_v11  ;;  %v1800_v49 = vpop.f32.mrb[11].mxu1  ;;  %v1813_v15 = vmax.f32 %v1795_v14, 0.0  ;;  %v2479_v18 = vpop.eup %2478 }
 0x375   :  { %v1801_v62 = vadd.f32 %v1800_v49, %v3750_v11  ;;  %v1814_v61 = vmax.f32 %v1797_v28, 0.0  ;;  %v1453_v11 = vshll.u32 %v1452_v12, 23  ;;  %v1540_v28 = vadd.s32 536870912, %v1539_v48 }
 0x376   :  { %v1815_v0 = vmax.f32 %v1799_v53, 0.0 }
 0x377   :  { %v1816_v52 = vmax.f32 %v1801_v62, 0.0  ;;  %v1454_v23 = vor.u32 4788187, %v1453_v11  ;;  %v4079_v57 = vshrl.u32 %v1540_v28, 30  ;;  %v1357_v28 = vsub.s32 4, %v3953_v19 }
 0x378   :  { %v1834_v33 = vpack.c.bf16 %v1815_v0, %v1813_v15  ;;  %v1462_v0 = vsel %vm1377_vm13, %v1461_v3, %v3987_v10  ;;  %v1267_v10 = vxor.u32 2147483648, %v2479_v18 }
 0x379   :  { %v1835_v44 = vpack.c.bf16 %v1816_v52, %v1814_v61  ;;  %v1804_v20 = vpop.f32.mrb[12].mxu1  ;;  %v1455_v1 = vand.u32 2147483647, %v1454_v23  ;;  %v1261_v61 = vand.u32 3, %v1260_v36  ;;  %v1542_v52 = vshll.u32 %v4079_v57, 30  ;;  %v1824_v23 = vld [vmem:[#allocation5 + $0x88] sm:$0xff] }
 0x37a   :  { %v1805_v29 = vadd.f32 %v1804_v20, %v3745_v54  ;;  %v1806_v39 = vpop.f32.mrb[13].mxu1  ;;  %v1464_v50 = vsel %vm4083_vm0, 0, %v1462_v0  ;;  %v1591_v36 = vmul.f32 %v4097_v25, %v3762_v43  ;;  %v1833_v0 = vpack.c.bf16 %v1825_v41, %v1825_v41 }
 0x37b   :  { %v1807_v27 = vadd.f32 %v1806_v39, %v3745_v54  ;;  %v1808_v14 = vpop.f32.mrb[14].mxu1  ;;  %1920 = vmatprep.subr.bf16.mxu0 %v1835_v44  ;;  %v1458_v53 = vmul.f32 %v1457_v45, %v1455_v1  ;;  %v2481_v54 = vpop.eup %2480  ;;  %v4094_v11 = vsub.s32 %v1539_v48, %v1542_v52  ;;  %vm1263_vm3 = vcmp.eq.s32.totalorder %v1261_v61, 0  ;;  %v1823_v39 = vld [vmem:[#allocation5 + $0x80] sm:$0xff] }
 0x37c   :  { %v1809_v58 = vadd.f32 %v1808_v14, %v3747_v56  ;;  %v1810_v47 = vpop.f32.mrb[15].mxu1  ;;  %1921 = vmatpush1.bf16.msra.mxu0 %v1834_v33  ;;  %v1817_v4 = vmax.f32 %v1805_v29, 0.0  ;;  %v1831_v33 = vpack.c.bf16 %v1822_v2, %v1821_v40  ;;  %v1264_v44 = vxor.u32 2147483648, %v2481_v54 }
 0x37d   :  { %v1811_v32 = vadd.f32 %v1810_v47, %v3747_v56  ;;  %v1818_v49 = vmax.f32 %v1807_v27, 0.0  ;;  %v1459_v15 = vxor.u32 2147483648, %v1458_v53  ;;  %vm1266_vm1 = vcmp.eq.s32.totalorder %v1261_v61, 2 }
 0x37e   :  { %v1819_v8 = vmax.f32 %v1809_v58, 0.0  ;;  %v1545_v20 = vsub.s32 0, %v4094_v11  ;;  %v1468_v21 = vadd.s32 3, %v1464_v50  ;;  %vm1262_vm6 = vcmp.lt.s32.totalorder %v1261_v61, 2 }
 0x37f   :  { %v1820_v7 = vmax.f32 %v1811_v32, 0.0  ;;  %v1460_v30 = vsel %vm1377_vm13, %v1459_v15, %v1458_v53  ;;  %v1265_v45 = vsel %vm1263_vm3, %v2479_v18, %v1264_v44  ;;  %v1268_v48 = vsel %vm1266_vm1, %v1267_v10, %v2481_v54 }
 0x380   :  { %v1836_v62 = vpack.c.bf16 %v1819_v8, %v1817_v4  ;;  %v1463_v24 = vsel %vm4083_vm0, %v3781_v16, %v1460_v30  ;;  %v2315_v29 = vmin.u32 %v1545_v20, %v4094_v11  ;;  %v1356_v58 = vsel %vm1273_vm2, %v1355_v26, %v1354_v34 }
 0x381   :  { %v1837_v12 = vpack.c.bf16 %v1820_v7, %v1818_v49  ;;  %2482 = vcosq.f32 %v1463_v24  ;;  %v1469_v47 = vand.u32 3, %v1468_v21  ;;  %v1832_v1 = vpack.c.bf16 %v1824_v23, %v1823_v39 }
 0x382   :  { %2484 = vsinq.f32 %v1463_v24  ;;  %v1547_v27 = vclz %v2315_v29  ;;  %v1269_v3 = vsel %vm1262_vm6, %v1265_v45, %v1268_v48  ;;  %v1359_v60 = vsel %vm4105_vm5, %v3770_v31, %v1356_v58 }
 0x383   :  { %1922 = vmatprep.subr.bf16.mxu0 %v1837_v12  ;;  %v1535_v18 = vadd.s32 %v4053_v13, %v4048_v17  ;;  %v1270_v4 = vsel %vm1259_vm7, nan, %v1269_v3  ;;  %vm1471_vm4 = vcmp.eq.s32.totalorder %v1469_v47, 0  ;;  %vm1474_vm10 = vcmp.eq.s32.totalorder %v1469_v47, 2  ;;  %v4129_v13 = vpop.permute.xlu0 %1588  ;;  %v1605_v12 = vpop.permute.xlu1 %1604 }
 0x384   :  { %1923 = vmatpush1.bf16.msra.mxu0 %v1836_v62  ;;  %v2316_v32 = vadd.s32 4294967294, %v1547_v27  ;;  %v1358_v17 = vsel %vm1273_vm2, %v1357_v28, %v3953_v19  ;;  %2486 = vcosq.f32 %v1359_v60  ;;  %vm1470_vm11 = vcmp.lt.s32.totalorder %v1469_v47, 2 }
 0x385   :  { %v1607_v40 = vmul.f32 %v4114_v46, %v1270_v4  ;;  %2488 = vsinq.f32 %v1359_v60  ;;  %v1593_v52 = vmul.f32 %v4129_v13, %v3772_v38  ;;  %v1565_v26 = vsub.s32 4, %v4079_v57 }
 0x386   :  { %vm2317_vm9 = vcmp.lt.s32.totalorder %v2316_v32, 0  ;;  %vm1363_vm1 = vweird.f32 %v3770_v31  ;;  %vm1571_vm7 = vweird.f32 %v3784_v6  ;;  %v1594_v31 = vmul.f32 %v4129_v13, %v3774_v59 }
 0x387   :  { %2325 = vmatmul.mubr.msk.bf16.vlgmr.msra.gmra.mrb[0].mxu0 %vm1753_vm14, %v1831_v33  ;;  %v1550_v8 = vsel %vm2317_vm9, 0, %v2316_v32  ;;  %v1360_v33 = vsel %vm4105_vm5, 0, %v1358_v17  ;;  %v1611_v50 = vadd.f32 %v1607_v40, %v1591_v36  ;;  %v1566_v45 = vsel %vm1481_vm12, %v1565_v26, %v4079_v57  ;;  %v1984_v59 = vpop.permute.xlu0 %1983 }
 0x388   :  { %1962 = vmatprep.mubr.bf16.mxu0 %v4288_v5  ;;  %v1551_v54 = vsub.s32 32, %v1550_v8  ;;  %v1552_v49 = vshll.u32 %v4094_v11, %v1550_v8  ;;  %v1555_v7 = vsub.s32 4294967266, %v1550_v8  ;;  %v1364_v38 = vadd.s32 3, %v1360_v33 }
 0x389   :  { %v1568_v47 = vsel %vm1480_vm15, 0, %v1566_v45  ;;  %v1592_v8 = vmul.f32 %v4097_v25, %v3764_v55  ;;  %vm2043_vm9 = vcmask 1047552  }
 0x38a   :  { %v1553_v56 = vshrl.u32 %v1535_v18, %v1551_v54  ;;  %v1556_v15 = vadd.s32 127, %v1555_v7  ;;  %v1365_v27 = vand.u32 3, %v1364_v38  ;;  %v1572_v32 = vadd.s32 3, %v1568_v47 }
 0x38b   :  { %v2483_v37 = vpop.eup %2482 }
 0x38c   :  { %v2485_v43 = vpop.eup %2484  ;;  %v1475_v53 = vxor.u32 2147483648, %v2483_v37  ;;  %v1554_v34 = vor.u32 %v1553_v56, %v1552_v49  ;;  %v1557_v30 = vshll.u32 %v1556_v15, 23  ;;  %vm1367_vm13 = vcmp.eq.s32.totalorder %v1365_v27, 0 }
 0x38d   :  { %v1472_v62 = vxor.u32 2147483648, %v2485_v43  ;;  %vm1370_vm0 = vcmp.eq.s32.totalorder %v1365_v27, 2  ;;  %vm1366_vm3 = vcmp.lt.s32.totalorder %v1365_v27, 2  ;;  %v1573_v22 = vand.u32 3, %v1572_v32 }
 0x38e   :  { %v1476_v2 = vsel %vm1474_vm10, %v1475_v53, %v2485_v43  ;;  %v1558_v11 = vor.u32 4788187, %v1557_v30  ;;  %v1561_v44 = vcvt.s32.f32 %v1554_v34  ;;  %v2487_v23 = vpop.eup %2486 }
 0x38f   :  { %2326 = vmatmul.mubr.msk.bf16.gmra.mrb[4].mxu0 %vm1753_vm14, %v1832_v1  ;;  %v1473_v61 = vsel %vm1471_vm4, %v2483_v37, %v1472_v62  ;;  %v2489_v48 = vpop.eup %2488  ;;  %v1371_v3 = vxor.u32 2147483648, %v2487_v23  ;;  %vm1578_vm2 = vcmp.eq.s32.totalorder %v1573_v22, 2  ;;  %vm1575_vm6 = vcmp.eq.s32.totalorder %v1573_v22, 0 }
 0x390   :  { %1972 = vmatprep.mubr.bf16.mxu0 %v4288_v5  ;;  %v1477_v19 = vsel %vm1470_vm11, %v1473_v61, %v1476_v2  ;;  %v1559_v20 = vand.u32 2147483647, %v1558_v11  ;;  %v1368_v1 = vxor.u32 2147483648, %v2489_v48  ;;  %vm1574_vm5 = vcmp.lt.s32.totalorder %v1573_v22, 2  ;;  %v2027_v22 = vld [vmem:[#allocation5 + $0xc8] sm:$0xff] }
 0x391   :  { %v1478_v24 = vsel %vm1467_vm8, nan, %v1477_v19  ;;  %v1372_v28 = vsel %vm1370_vm0, %v1371_v3, %v2489_v48  ;;  %vm2042_vm8 = vcmask 1046528   ;;  %vm2038_vm4 = vcmask 121856  }
 0x392   :  { %v1609_v10 = vmul.f32 %v1605_v12, %v1478_v24  ;;  %v1562_v29 = vmul.f32 %v1561_v44, %v1559_v20  ;;  %v1369_v36 = vsel %vm1367_vm13, %v2487_v23, %v1368_v1  ;;  %v2044_v17 = vsel %vm2042_vm8, 4294967295, %v2591_v35  ;;  %v1989_v35 = vpop.permute.xlu1 %1988 }
 0x393   :  { %v1373_v57 = vsel %vm1366_vm3, %v1369_v36, %v1372_v28  ;;  %v2045_v25 = vsel %vm2043_vm9, %v2044_v17, 0  ;;  %v2595_v3 = vmov 1966171168   ;;  %v2026_v28 = vld [vmem:[#allocation5 + $0xc0] sm:$0xff] }
 0x394   :  { %v1613_v21 = vadd.f32 %v1609_v10, %v1593_v52  ;;  %v1563_v16 = vxor.u32 2147483648, %v1562_v29  ;;  %v1374_v18 = vsel %vm1363_vm1, nan, %v1373_v57  ;;  %v2234_v32 = vunpack.c.l.s4 %v2595_v3 }
 0x395   :  { %v1608_v41 = vmul.f32 %v4114_v46, %v1374_v18 }
 0x396   :  { %v2036_v39 = vpack.c.bf16 %v1613_v21, %v1611_v50  ;;  %v1564_v14 = vsel %vm1481_vm12, %v1563_v16, %v1562_v29  ;;  %v1994_v13 = vpop.permute.xlu1 %1993  ;;  %v1999_v29 = vpop.permute.xlu0 %1998 }
 0x397   :  { %2327 = vmatmul.mubr.msk.bf16.gmra.mrb[12].mxu0 %vm1753_vm14, %v1833_v0  ;;  %v1567_v58 = vsel %vm1480_vm15, %v3784_v6, %v1564_v14  ;;  %v1612_v62 = vadd.f32 %v1608_v41, %v1592_v8  ;;  %v1904_v6 = vpop.f32.mrb[8].mxu0  ;;  %v2030_v41 = vpack.c.bf16 %v2027_v22, %v2026_v28 }
 0x398   :  { %2490 = vcosq.f32 %v1567_v58  ;;  %v2047_v56 = vand.u32 %v2045_v25, %v2036_v39  ;;  %v1906_v15 = vpop.f32.mrb[9].mxu0 }
 0x399   :  { %2492 = vsinq.f32 %v1567_v58  ;;  %v1908_v0 = vpop.f32.mrb[10].mxu0 }
 0x39a   :  { %v1909_v61 = vpop.f32.mrb[11].mxu0  ;;  %v2144_v11 = vpop.permute.xlu1 %2143 }
 0x39e   :  { %v2166_v16 = vpop.permute.xlu1 %2165 }
 0x3a2   :  { %v2491_v60 = vpop.eup %2490  ;;  %v2004_v18 = vpop.permute.xlu1 %2003 }
 0x3a3   :  { %v2493_v37 = vpop.eup %2492  ;;  %v1579_v4 = vxor.u32 2147483648, %v2491_v60 }
 0x3a4   :  { %v1576_v43 = vxor.u32 2147483648, %v2493_v37 }
 0x3a5   :  { %v1580_v53 = vsel %vm1578_vm2, %v1579_v4, %v2493_v37 }
 0x3a6   :  { %v1577_v54 = vsel %vm1575_vm6, %v2491_v60, %v1576_v43  ;;  %v2235_v43 = vunpack.c.0.s8 %v2234_v32 }
 0x3a7   :  { %v1581_v49 = vsel %vm1574_vm5, %v1577_v54, %v1580_v53 }
 0x3a8   :  { %v1582_v7 = vsel %vm1571_vm7, nan, %v1581_v49  ;;  %v2238_v17 = vsub.s32 %v2235_v43, %v4293_v51 }
 0x3a9   :  { %v1610_v40 = vmul.f32 %v1605_v12, %v1582_v7 }
 0x3ab   :  { %v1614_v55 = vadd.f32 %v1610_v40, %v1594_v31 }
 0x3ad   :  { %v2037_v2 = vpack.c.bf16 %v1614_v55, %v1612_v62 }
 0x3af   :  { %v2050_v46 = vand.u32 %v2045_v25, %v2037_v2  ;;  %v4302_v25 = vlaneseq }
 0x3b1   :  { %2052 = vmatprep.subr.bf16.mxu1 %v2050_v46  ;;  %vm2250_vm10 = vcmp.lt.s32.totalorder %v4302_v25, 256  ;;  %v2149_v46 = vpop.permute.xlu0 %2148 }
 0x3b2   :  { %2053 = vmatpush1.bf16.msra.mxu1 %v2047_v56 }
 0x3b5   :  { %2328 = vmatmul.mubr.msk.bf16.vlgmr.msra.gmra.mrb[16].mxu1 %vm2038_vm4, %v2035_v42 }
 0x3b6   :  { %2130 = vmatprep.mubr.bf16.mxu1 %v4288_v5 }
 0x45a   :  { %v1954_v12 = vpop.f32.mrb[0].mxu0 }
 0x45b   :  { %v2006_v52 = vadd.f32 %v1984_v59, %v1954_v12  ;;  %v1956_v19 = vpop.f32.mrb[1].mxu0 }
 0x45c   :  { %v2007_v34 = vadd.f32 %v1984_v59, %v1956_v19  ;;  %v1958_v30 = vpop.f32.mrb[2].mxu0 }
 0x45d   :  { %v2008_v33 = vadd.f32 %v1989_v35, %v1958_v30  ;;  %v1960_v24 = vpop.f32.mrb[3].mxu0  ;;  %v2016_v44 = vmax.f32 %v2006_v52, 0.0  ;;  %v2502_v30 = vld [vmem:[#allocation5 + $0xe0] sm:$0x7] }
 0x45e   :  { %v2009_v50 = vadd.f32 %v1989_v35, %v1960_v24  ;;  %v2017_v20 = vmax.f32 %v2007_v34, 0.0 }
 0x45f   :  { %v2018_v10 = vmax.f32 %v2008_v33, 0.0  ;;  %v2160_v33 = vpack.c.bf16 %v2502_v30, %v2502_v30 }
 0x460   :  { %v2019_v26 = vmax.f32 %v2009_v50, 0.0 }
 0x461   :  { %v2031_v63 = vpack.c.bf16 %v2018_v10, %v2016_v44 }
 0x462   :  { %v2032_v9 = vpack.c.bf16 %v2019_v26, %v2017_v20  ;;  %v1964_v42 = vpop.f32.mrb[4].mxu0 }
 0x463   :  { %v2010_v21 = vadd.f32 %v1994_v13, %v1964_v42  ;;  %v1966_v38 = vpop.f32.mrb[5].mxu0 }
 0x464   :  { %v2011_v39 = vadd.f32 %v1994_v13, %v1966_v38  ;;  %v1968_v23 = vpop.f32.mrb[6].mxu0  ;;  %2098 = vmatprep.subr.bf16.mxu1 %v2032_v9 }
 0x465   :  { %v2012_v45 = vadd.f32 %v1999_v29, %v1968_v23  ;;  %v1970_v48 = vpop.f32.mrb[7].mxu0  ;;  %2099 = vmatpush1.bf16.msra.mxu1 %v2031_v63  ;;  %v2020_v14 = vmax.f32 %v2010_v21, 0.0 }
 0x466   :  { %v2013_v27 = vadd.f32 %v1999_v29, %v1970_v48  ;;  %v2021_v47 = vmax.f32 %v2011_v39, 0.0 }
 0x467   :  { %v2022_v58 = vmax.f32 %v2012_v45, 0.0 }
 0x468   :  { %v2023_v1 = vmax.f32 %v2013_v27, 0.0 }
 0x469   :  { %v2033_v36 = vpack.c.bf16 %v2022_v58, %v2020_v14 }
 0x46a   :  { %v2034_v57 = vpack.c.bf16 %v2023_v1, %v2021_v47  ;;  %v1974_v60 = vpop.f32.mrb[12].mxu0 }
 0x46b   :  { %v1975_v37 = vadd.f32 %v1974_v60, %v1904_v6  ;;  %v1976_v4 = vpop.f32.mrb[13].mxu0 }
 0x46c   :  { %v1977_v8 = vadd.f32 %v1976_v4, %v1906_v15  ;;  %2100 = vmatprep.subr.bf16.mxu1 %v2034_v57  ;;  %v1978_v53 = vpop.f32.mrb[14].mxu0 }
 0x46d   :  { %v2014_v54 = vadd.f32 %v2004_v18, %v1975_v37  ;;  %2101 = vmatpush1.bf16.msra.mxu1 %v2033_v36  ;;  %v1979_v31 = vpop.f32.mrb[15].mxu0 }
 0x46e   :  { %v2015_v49 = vadd.f32 %v2004_v18, %v1977_v8 }
 0x46f   :  { %v2024_v7 = vmax.f32 %v2014_v54, 0.0 }
 0x470   :  { %v2025_v62 = vmax.f32 %v2015_v49, 0.0  ;;  %2329 = vmatmul.mubr.msk.bf16.vlgmr.msra.gmra.mrb[16].mxu1 %vm1753_vm14, %v2030_v41  ;;  %vm2168_vm14 = vcmask 130048  }
 0x471   :  { %2204 = vmatprep.mubr.bf16.mxu1 %v4288_v5 }
 0x472   :  { %v2232_v40 = vcombine.low %v2024_v7, %v2025_v62 }
 0x474   :  { %v2239_v55 = vrot.slane %v2232_v40, %v2238_v17 }
 0x476   :  { %v2246_v2 = vrot.slane %v2239_v55, %v2238_v17 }
 0x478   :  { %2253 = vst.msk [vmem:[#allocation7 + $0x3] ss:$4 sm:$0x3] %vm2250_vm10, %v2246_v2 }
 0x543   :  { %v2132_v56 = vpop.f32.mrb[16].mxu1 }
 0x544   :  { %v2151_v6 = vadd.f32 %v2144_v11, %v2132_v56  ;;  %v2134_v15 = vpop.f32.mrb[17].mxu1 }
 0x545   :  { %v2152_v0 = vadd.f32 %v2144_v11, %v2134_v15  ;;  %v2136_v61 = vpop.f32.mrb[18].mxu1 }
 0x546   :  { %v2153_v35 = vadd.f32 %v2149_v46, %v2136_v61  ;;  %v2138_v59 = vpop.f32.mrb[19].mxu1  ;;  %v2155_v13 = vmax.f32 %v2151_v6, 0.0 }
 0x547   :  { %v2154_v51 = vadd.f32 %v2149_v46, %v2138_v59  ;;  %v2156_v52 = vmax.f32 %v2152_v0, 0.0 }
 0x548   :  { %v2157_v12 = vmax.f32 %v2153_v35, 0.0 }
 0x549   :  { %v2158_v19 = vmax.f32 %v2154_v51, 0.0 }
 0x54a   :  { %v2161_v5 = vpack.c.bf16 %v2157_v12, %v2155_v13 }
 0x54b   :  { %v2162_v34 = vpack.c.bf16 %v2158_v19, %v2156_v52 }
 0x54d   :  { %2172 = vmatprep.subr.bf16.mxu1 %v2162_v34 }
 0x54e   :  { %2173 = vmatpush1.bf16.msra.mxu1 %v2161_v5 }
 0x551   :  { %2330 = vmatmul.mubr.msk.bf16.vlgmr.msra.gmra.mrb[20].mxu1 %vm2168_vm14, %v2160_v33 }
 0x624   :  { %v2206_v24 = vpop.f32.mrb[20].mxu1 }
 0x625   :  { %v2207_v50 = vadd.f32 %v2206_v24, %v2166_v16  ;;  %v2208_v44 = vpop.f32.mrb[21].mxu1 }
 0x626   :  { %v2209_v11 = vadd.f32 %v2208_v44, %v2166_v16  ;;  %v2210_v10 = vpop.f32.mrb[22].mxu1 }
 0x627   :  { %v2331_v20 = vmul.f32 -1.442695, %v2207_v50  ;;  %v2211_v26 = vpop.f32.mrb[23].mxu1 }
 0x628   :  { %v2332_v63 = vmul.f32 -1.442695, %v2209_v11 }
 0x629   :  { %2494 = vpow2.f32 %v2331_v20 }
 0x62a   :  { %2496 = vpow2.f32 %v2332_v63 }
 0x633   :  { %v2495_v9 = vpop.eup %2494 }
 0x634   :  { %v2497_v42 = vpop.eup %2496  ;;  %v2219_v21 = vadd.f32 1.0, %v2495_v9 }
 0x635   :  { %v2220_v38 = vadd.f32 1.0, %v2497_v42 }
 0x636   :  { %2498 = vrcp.f32 %v2219_v21 }
 0x637   :  { %2500 = vrcp.f32 %v2220_v38 }
 0x640   :  { %v2499_v29 = vpop.eup %2498 }
 0x641   :  { %v2501_v39 = vpop.eup %2500 }
 0x642   :  { %v2227_v23 = vcombine.low %v2499_v29, %v2501_v39 }
 0x644   :  { %2229 = vst [vmem:[#allocation7] sm:$0x77] %v2227_v23 }
 0x645   :  { %2558 = shalt.err (!%p2555_p6)
}
 0x646   :  { %s2559_s10 = scalar_lea.hbm %s4177_s2, 128 }
 0x647   :  { %p2560_p7 = scmp.ne.s32.totalorder %s4177_s2, %s2559_s10  ;;  %p2563_p8 = scmp.lt.u32.totalorder %s2559_s10, %s4177_s2 }
 0x649   :  { %p2565_p9 = pnand %p2563_p8, %p2560_p7 }
 0x64b   :  { %2568 = shalt.err (!%p2565_p9)
}
 0x64c   :  { %2263 = dma.vmem_to_hbm [thread:$0]  %s2261_s6, 128, %s4177_s2, [#allocation4]  }
 0x64d   :  { %2573 = dma.done.wait [#allocation4], 128  }
 0x64e   :  { %2574 = vsyncadd [#allocation4], 4294967168 }
 0x64f   :  { %2267 = vsyncpa [#allocation3], 1 }
 0x650   :  { %2268 = vsyncpa [#allocation6], 1 }
 0x651   :  { %2269 = vsyncpa [#allocation4], 1 }

</bundles_post_ra>
